<compile_context>
chip_gen: v6e
topology: v6e:2x2x1
jax: 0.10.0
libtpu: 0.0.40
codegen_flags: <defaults>
</compile_context>

<pallas_src>
import jax
import jax.numpy as jnp
from jax.experimental import pallas as pl
from jax.experimental.pallas import tpu as pltpu


# ----------------------------- in-kernel math ------------------------------

_SELU_ALPHA = 1.6732632423543772848170429916717
_SELU_SCALE = 1.0507009873554804934193349852946


def _selu(x):
    # f32 elementwise (VPU) + exp (EUP).
    return _SELU_SCALE * jnp.where(x > 0, x, _SELU_ALPHA * (jnp.exp(x) - 1.0))


def _sigmoid(x):
    # exp + approximate reciprocal both live on the EUP slot.
    return pl.reciprocal(1.0 + jnp.exp(-x), approx=True)


def _dot_bf16(a_f32, w_ref):
    # Cast only the MXU operands to bf16; accumulate in f32.
    return jnp.dot(a_f32.astype(jnp.bfloat16), w_ref[...],
                   preferred_element_type=jnp.float32)


def autoencoder_kernel(x_ref,
                       w1t_ref, w2t_ref, w3t_ref,     # [in, out]  (encoder, pre-transposed)
                       w1_ref, w2_ref, w3_ref,        # [out, in]  (decoder, as stored)
                       eb1_ref, eb2_ref, eb3_ref,
                       db1_ref, db2_ref, db3_ref,
                       out_ref):
    x = x_ref[...].astype(jnp.float32)

    # ----- encoder: h = selu(h @ W_i^T + eb_i)  (W_i^T pre-materialized) -----
    h = _selu(_dot_bf16(x, w1t_ref) + eb1_ref[...])
    h = _selu(_dot_bf16(h, w2t_ref) + eb2_ref[...])
    h = _selu(_dot_bf16(h, w3t_ref) + eb3_ref[...])
    # dp_drop_prob == 0.0 -> no dropout (matches PyTorch default).
    # TODO(synk): dropout path (dp_drop_prob > 0) would need pltpu.prng_* bits.

    # ----- decoder: reversed weights, untransposed; last layer sigmoid -----
    z = _selu(_dot_bf16(h, w3_ref) + db1_ref[...])
    z = _selu(_dot_bf16(z, w2_ref) + db2_ref[...])
    z = _sigmoid(_dot_bf16(z, w1_ref) + db3_ref[...])

    out_ref[...] = z.astype(out_ref.dtype)


# ------------------------------ host wrapper -------------------------------

def autoencoder_forward(x, weights, enc_biases, dec_biases, *, tb=128):
    """x: [B, input_size] f32. weights[i]: [out_i, in_i] f32. biases: (1, dim) f32."""
    B, input_size = x.shape
    tb = min(tb, max(8, B))                      # don't over-tile tiny batches
    num_tiles = pl.cdiv(B, tb)
    B_pad = num_tiles * tb
    if B_pad != B:
        x = jnp.pad(x, ((0, B_pad - B), (0, 0)))

    # bf16 weights (halve VMEM + 2x MXU throughput on v6e/v7x); transpose the
    # encoder copies once on the host so the kernel never transposes weights.
    w_dec = [w.astype(jnp.bfloat16) for w in weights]        # [out, in]
    w_enc = [w.T for w in w_dec]                             # [in, out]

    # ---- BlockSpecs ----
    act_spec = pl.BlockSpec((tb, input_size), lambda i: (i, 0))

    def resident(arr):  # whole array, constant block index -> DMA'd once, stays in VMEM
        return pl.BlockSpec(arr.shape, lambda i: (0, 0))

    in_specs = ([act_spec]
                + [resident(w) for w in w_enc]
                + [resident(w) for w in w_dec]
                + [resident(b) for b in enc_biases]
                + [resident(b) for b in dec_biases])

    # ---- cost estimate (hint for XLA's scheduler) ----
    mm_flops_per_row = 2 * sum(w.shape[0] * w.shape[1] for w in weights) * 2  # enc + dec
    weight_bytes = 2 * sum(w.size * 2 for w in weights)                       # bf16, 2 copies
    bias_bytes = sum(b.size * 4 for b in enc_biases + dec_biases)
    cost = pl.CostEstimate(
        flops=mm_flops_per_row * B_pad,
        transcendentals=B_pad * (sum(w.shape[0] for w in weights)          # enc selu exps
                                 + sum(w.shape[1] for w in weights)        # dec selu/sigmoid exps
                                 + input_size),                            # sigmoid recip
        bytes_accessed=2 * B_pad * input_size * 4 + weight_bytes + bias_bytes,
    )

    out = pl.pallas_call(
        autoencoder_kernel,
        out_shape=jax.ShapeDtypeStruct((B_pad, input_size), jnp.float32),
        grid=(num_tiles,),
        in_specs=in_specs,
        out_specs=act_spec,
        compiler_params=pltpu.CompilerParams(
            dimension_semantics=("parallel",),     # megacore sharding on v7x
            vmem_limit_bytes=32 * 1024 * 1024,     # explicit budget, fits v7x's 64 MiB
        ),
        cost_estimate=cost,
    )(x, *w_enc, *w_dec, *enc_biases, *dec_biases)

    return out[:B] if B_pad != B else out


# --------------------------- deterministic params ---------------------------

def xavier_uniform(key, shape):
    fan_out, fan_in = shape
    limit = (6.0 / (fan_in + fan_out)) ** 0.5
    return jax.random.uniform(key, shape, jnp.float32, -limit, limit)


def build_params(key, input_size, layer_sizes):
    sizes = [input_size] + list(layer_sizes)
    keys = jax.random.split(key, len(sizes) - 1)
    weights = [xavier_uniform(keys[i], (sizes[i + 1], sizes[i]))
               for i in range(len(sizes) - 1)]
    enc_biases = [jnp.zeros((1, sizes[i + 1]), jnp.float32)
                  for i in range(len(sizes) - 1)]
    rev = list(reversed(sizes))
    dec_biases = [jnp.zeros((1, rev[i + 1]), jnp.float32)
                  for i in range(len(rev) - 1)]
    return weights, enc_biases, dec_biases


# ------------------------------- reference ---------------------------------

def reference_forward(x, weights, enc_biases, dec_biases):
    """Pure f32 JAX reference matching the PyTorch module."""
    def selu(y):
        return _SELU_SCALE * jnp.where(y > 0, y, _SELU_ALPHA * (jnp.exp(y) - 1.0))

    h = x
    for w, b in zip(weights, enc_biases):
        h = selu(h @ w.T + b)
    z = h
    last = len(weights) - 1
    for idx, w in enumerate(reversed(weights)):
        y = z @ w + dec_biases[idx]
        z = jax.nn.sigmoid(y) if idx == last else selu(y)
    return z


# ---------------------------------- main ------------------------------------

if __name__ == "__main__":
    # Small, TPU-friendly shapes consistent with the module's structure
    # (input_size, [l1, l2, l3]); batch is a multiple of the 128-row tile.
    batch = 256
    input_size = 256
    layer_sizes = [128, 128, 256]

    key = jax.random.PRNGKey(0)
    k_x, k_w = jax.random.split(key)

    x = jax.random.uniform(k_x, (batch, input_size), jnp.float32)
    weights, enc_biases, dec_biases = build_params(k_w, input_size, layer_sizes)

    out = autoencoder_forward(x, weights, enc_biases, dec_biases, tb=128)
    out = jax.block_until_ready(out)

    ref = reference_forward(x, weights, enc_biases, dec_biases)
    assert out.shape == (batch, input_size)
    # bf16 MXU operands + approx reciprocal -> loosened tolerance vs f32 reference.
    assert jnp.allclose(out, ref, atol=2e-2, rtol=2e-2), "mismatch vs reference"
    assert bool(jnp.all(jnp.isfinite(out))), "non-finite output"

    print("KERNEL_OK")
</pallas_src>

<mosaic_0001>
module attributes {stable_mosaic.version = 11 : i64} {
  func.func @autoencoder_kernel(%arg0: i32, %arg1: memref<128x256xf32, #tpu.memory_space<vmem>>, %arg2: memref<256x128xbf16, #tpu.memory_space<vmem>>, %arg3: memref<128x128xbf16, #tpu.memory_space<vmem>>, %arg4: memref<128x256xbf16, #tpu.memory_space<vmem>>, %arg5: memref<128x256xbf16, #tpu.memory_space<vmem>>, %arg6: memref<128x128xbf16, #tpu.memory_space<vmem>>, %arg7: memref<256x128xbf16, #tpu.memory_space<vmem>>, %arg8: memref<1x128xf32, #tpu.memory_space<vmem>>, %arg9: memref<1x128xf32, #tpu.memory_space<vmem>>, %arg10: memref<1x256xf32, #tpu.memory_space<vmem>>, %arg11: memref<1x128xf32, #tpu.memory_space<vmem>>, %arg12: memref<1x128xf32, #tpu.memory_space<vmem>>, %arg13: memref<1x256xf32, #tpu.memory_space<vmem>>, %arg14: memref<128x256xf32, #tpu.memory_space<vmem>>) attributes {dimension_semantics = [#tpu.dimension_semantics<parallel>], iteration_bounds = array<i64: 2>, scalar_prefetch = 0 : i64, scratch_operands = 0 : i64, tpu.core_type = #tpu.core_type<tc>, window_params = [{transform_indices = @transform_0, window_bounds = array<i64: 128, 256>}, {pipeline_mode = #tpu.pipeline_mode<synchronous>, transform_indices = @transform_1, window_bounds = array<i64: 256, 128>}, {pipeline_mode = #tpu.pipeline_mode<synchronous>, transform_indices = @transform_2, window_bounds = array<i64: 128, 128>}, {pipeline_mode = #tpu.pipeline_mode<synchronous>, transform_indices = @transform_3, window_bounds = array<i64: 128, 256>}, {pipeline_mode = #tpu.pipeline_mode<synchronous>, transform_indices = @transform_4, window_bounds = array<i64: 128, 256>}, {pipeline_mode = #tpu.pipeline_mode<synchronous>, transform_indices = @transform_5, window_bounds = array<i64: 128, 128>}, {pipeline_mode = #tpu.pipeline_mode<synchronous>, transform_indices = @transform_6, window_bounds = array<i64: 256, 128>}, {pipeline_mode = #tpu.pipeline_mode<synchronous>, transform_indices = @transform_7, window_bounds = array<i64: 1, 128>}, {pipeline_mode = #tpu.pipeline_mode<synchronous>, transform_indices = @transform_8, window_bounds = array<i64: 1, 128>}, {pipeline_mode = #tpu.pipeline_mode<synchronous>, transform_indices = @transform_9, window_bounds = array<i64: 1, 256>}, {pipeline_mode = #tpu.pipeline_mode<synchronous>, transform_indices = @transform_10, window_bounds = array<i64: 1, 128>}, {pipeline_mode = #tpu.pipeline_mode<synchronous>, transform_indices = @transform_11, window_bounds = array<i64: 1, 128>}, {pipeline_mode = #tpu.pipeline_mode<synchronous>, transform_indices = @transform_12, window_bounds = array<i64: 1, 256>}, {transform_indices = @transform_13, window_bounds = array<i64: 128, 256>}]} {
    %c0 = arith.constant 0 : index
    %c0_0 = arith.constant 0 : index
    %0 = vector.load %arg1[%c0, %c0_0] : memref<128x256xf32, #tpu.memory_space<vmem>>, vector<128x256xf32>
    %1 = arith.truncf %0 : vector<128x256xf32> to vector<128x256xbf16>
    %c0_1 = arith.constant 0 : index
    %c0_2 = arith.constant 0 : index
    %2 = vector.load %arg2[%c0_1, %c0_2] : memref<256x128xbf16, #tpu.memory_space<vmem>>, vector<256x128xbf16>
    %cst = arith.constant dense<0.000000e+00> : vector<128x128xf32>
    %3 = tpu.matmul %1, %2, %cst {dimension_numbers = #tpu.dot_dimension_numbers<[1], [0], [0], [1], [0, 0, 1, 1], [], []>} : vector<128x256xbf16>, vector<256x128xbf16>, vector<128x128xf32> -> vector<128x128xf32>
    %c0_3 = arith.constant 0 : index
    %c0_4 = arith.constant 0 : index
    %4 = vector.load %arg8[%c0_3, %c0_4] : memref<1x128xf32, #tpu.memory_space<vmem>>, vector<1x128xf32>
    %5 = vector.broadcast %4 : vector<1x128xf32> to vector<128x128xf32>
    %6 = arith.addf %3, %5 : vector<128x128xf32>
    %cst_5 = arith.constant 0.000000e+00 : f32
    %7 = vector.broadcast %cst_5 : f32 to vector<128x128xf32>
    %8 = arith.cmpf ogt, %6, %7 : vector<128x128xf32>
    %9 = math.exp %6 : vector<128x128xf32>
    %cst_6 = arith.constant 1.000000e+00 : f32
    %10 = vector.broadcast %cst_6 : f32 to vector<128x128xf32>
    %11 = arith.subf %9, %10 : vector<128x128xf32>
    %cst_7 = arith.constant 1.67326319 : f32
    %12 = vector.broadcast %cst_7 : f32 to vector<128x128xf32>
    %13 = arith.mulf %12, %11 : vector<128x128xf32>
    %14 = arith.select %8, %6, %13 : vector<128x128xi1>, vector<128x128xf32>
    %cst_8 = arith.constant 1.05070102 : f32
    %15 = vector.broadcast %cst_8 : f32 to vector<128x128xf32>
    %16 = arith.mulf %15, %14 : vector<128x128xf32>
    %17 = arith.truncf %16 : vector<128x128xf32> to vector<128x128xbf16>
    %c0_9 = arith.constant 0 : index
    %c0_10 = arith.constant 0 : index
    %18 = vector.load %arg3[%c0_9, %c0_10] : memref<128x128xbf16, #tpu.memory_space<vmem>>, vector<128x128xbf16>
    %cst_11 = arith.constant dense<0.000000e+00> : vector<128x128xf32>
    %19 = tpu.matmul %17, %18, %cst_11 {dimension_numbers = #tpu.dot_dimension_numbers<[1], [0], [0], [1], [0, 0, 1, 1], [], []>} : vector<128x128xbf16>, vector<128x128xbf16>, vector<128x128xf32> -> vector<128x128xf32>
    %c0_12 = arith.constant 0 : index
    %c0_13 = arith.constant 0 : index
    %20 = vector.load %arg9[%c0_12, %c0_13] : memref<1x128xf32, #tpu.memory_space<vmem>>, vector<1x128xf32>
    %21 = vector.broadcast %20 : vector<1x128xf32> to vector<128x128xf32>
    %22 = arith.addf %19, %21 : vector<128x128xf32>
    %cst_14 = arith.constant 0.000000e+00 : f32
    %23 = vector.broadcast %cst_14 : f32 to vector<128x128xf32>
    %24 = arith.cmpf ogt, %22, %23 : vector<128x128xf32>
    %25 = math.exp %22 : vector<128x128xf32>
    %cst_15 = arith.constant 1.000000e+00 : f32
    %26 = vector.broadcast %cst_15 : f32 to vector<128x128xf32>
    %27 = arith.subf %25, %26 : vector<128x128xf32>
    %cst_16 = arith.constant 1.67326319 : f32
    %28 = vector.broadcast %cst_16 : f32 to vector<128x128xf32>
    %29 = arith.mulf %28, %27 : vector<128x128xf32>
    %30 = arith.select %24, %22, %29 : vector<128x128xi1>, vector<128x128xf32>
    %cst_17 = arith.constant 1.05070102 : f32
    %31 = vector.broadcast %cst_17 : f32 to vector<128x128xf32>
    %32 = arith.mulf %31, %30 : vector<128x128xf32>
    %33 = arith.truncf %32 : vector<128x128xf32> to vector<128x128xbf16>
    %c0_18 = arith.constant 0 : index
    %c0_19 = arith.constant 0 : index
    %34 = vector.load %arg4[%c0_18, %c0_19] : memref<128x256xbf16, #tpu.memory_space<vmem>>, vector<128x256xbf16>
    %cst_20 = arith.constant dense<0.000000e+00> : vector<128x256xf32>
    %35 = tpu.matmul %33, %34, %cst_20 {dimension_numbers = #tpu.dot_dimension_numbers<[1], [0], [0], [1], [0, 0, 1, 1], [], []>} : vector<128x128xbf16>, vector<128x256xbf16>, vector<128x256xf32> -> vector<128x256xf32>
    %c0_21 = arith.constant 0 : index
    %c0_22 = arith.constant 0 : index
    %36 = vector.load %arg10[%c0_21, %c0_22] : memref<1x256xf32, #tpu.memory_space<vmem>>, vector<1x256xf32>
    %37 = vector.broadcast %36 : vector<1x256xf32> to vector<128x256xf32>
    %38 = arith.addf %35, %37 : vector<128x256xf32>
    %cst_23 = arith.constant 0.000000e+00 : f32
    %39 = vector.broadcast %cst_23 : f32 to vector<128x256xf32>
    %40 = arith.cmpf ogt, %38, %39 : vector<128x256xf32>
    %41 = math.exp %38 : vector<128x256xf32>
    %cst_24 = arith.constant 1.000000e+00 : f32
    %42 = vector.broadcast %cst_24 : f32 to vector<128x256xf32>
    %43 = arith.subf %41, %42 : vector<128x256xf32>
    %cst_25 = arith.constant 1.67326319 : f32
    %44 = vector.broadcast %cst_25 : f32 to vector<128x256xf32>
    %45 = arith.mulf %44, %43 : vector<128x256xf32>
    %46 = arith.select %40, %38, %45 : vector<128x256xi1>, vector<128x256xf32>
    %cst_26 = arith.constant 1.05070102 : f32
    %47 = vector.broadcast %cst_26 : f32 to vector<128x256xf32>
    %48 = arith.mulf %47, %46 : vector<128x256xf32>
    %49 = arith.truncf %48 : vector<128x256xf32> to vector<128x256xbf16>
    %c0_27 = arith.constant 0 : index
    %c0_28 = arith.constant 0 : index
    %50 = vector.load %arg7[%c0_27, %c0_28] : memref<256x128xbf16, #tpu.memory_space<vmem>>, vector<256x128xbf16>
    %cst_29 = arith.constant dense<0.000000e+00> : vector<128x128xf32>
    %51 = tpu.matmul %49, %50, %cst_29 {dimension_numbers = #tpu.dot_dimension_numbers<[1], [0], [0], [1], [0, 0, 1, 1], [], []>} : vector<128x256xbf16>, vector<256x128xbf16>, vector<128x128xf32> -> vector<128x128xf32>
    %c0_30 = arith.constant 0 : index
    %c0_31 = arith.constant 0 : index
    %52 = vector.load %arg11[%c0_30, %c0_31] : memref<1x128xf32, #tpu.memory_space<vmem>>, vector<1x128xf32>
    %53 = vector.broadcast %52 : vector<1x128xf32> to vector<128x128xf32>
    %54 = arith.addf %51, %53 : vector<128x128xf32>
    %cst_32 = arith.constant 0.000000e+00 : f32
    %55 = vector.broadcast %cst_32 : f32 to vector<128x128xf32>
    %56 = arith.cmpf ogt, %54, %55 : vector<128x128xf32>
    %57 = math.exp %54 : vector<128x128xf32>
    %cst_33 = arith.constant 1.000000e+00 : f32
    %58 = vector.broadcast %cst_33 : f32 to vector<128x128xf32>
    %59 = arith.subf %57, %58 : vector<128x128xf32>
    %cst_34 = arith.constant 1.67326319 : f32
    %60 = vector.broadcast %cst_34 : f32 to vector<128x128xf32>
    %61 = arith.mulf %60, %59 : vector<128x128xf32>
    %62 = arith.select %56, %54, %61 : vector<128x128xi1>, vector<128x128xf32>
    %cst_35 = arith.constant 1.05070102 : f32
    %63 = vector.broadcast %cst_35 : f32 to vector<128x128xf32>
    %64 = arith.mulf %63, %62 : vector<128x128xf32>
    %65 = arith.truncf %64 : vector<128x128xf32> to vector<128x128xbf16>
    %c0_36 = arith.constant 0 : index
    %c0_37 = arith.constant 0 : index
    %66 = vector.load %arg6[%c0_36, %c0_37] : memref<128x128xbf16, #tpu.memory_space<vmem>>, vector<128x128xbf16>
    %cst_38 = arith.constant dense<0.000000e+00> : vector<128x128xf32>
    %67 = tpu.matmul %65, %66, %cst_38 {dimension_numbers = #tpu.dot_dimension_numbers<[1], [0], [0], [1], [0, 0, 1, 1], [], []>} : vector<128x128xbf16>, vector<128x128xbf16>, vector<128x128xf32> -> vector<128x128xf32>
    %c0_39 = arith.constant 0 : index
    %c0_40 = arith.constant 0 : index
    %68 = vector.load %arg12[%c0_39, %c0_40] : memref<1x128xf32, #tpu.memory_space<vmem>>, vector<1x128xf32>
    %69 = vector.broadcast %68 : vector<1x128xf32> to vector<128x128xf32>
    %70 = arith.addf %67, %69 : vector<128x128xf32>
    %cst_41 = arith.constant 0.000000e+00 : f32
    %71 = vector.broadcast %cst_41 : f32 to vector<128x128xf32>
    %72 = arith.cmpf ogt, %70, %71 : vector<128x128xf32>
    %73 = math.exp %70 : vector<128x128xf32>
    %cst_42 = arith.constant 1.000000e+00 : f32
    %74 = vector.broadcast %cst_42 : f32 to vector<128x128xf32>
    %75 = arith.subf %73, %74 : vector<128x128xf32>
    %cst_43 = arith.constant 1.67326319 : f32
    %76 = vector.broadcast %cst_43 : f32 to vector<128x128xf32>
    %77 = arith.mulf %76, %75 : vector<128x128xf32>
    %78 = arith.select %72, %70, %77 : vector<128x128xi1>, vector<128x128xf32>
    %cst_44 = arith.constant 1.05070102 : f32
    %79 = vector.broadcast %cst_44 : f32 to vector<128x128xf32>
    %80 = arith.mulf %79, %78 : vector<128x128xf32>
    %81 = arith.truncf %80 : vector<128x128xf32> to vector<128x128xbf16>
    %c0_45 = arith.constant 0 : index
    %c0_46 = arith.constant 0 : index
    %82 = vector.load %arg5[%c0_45, %c0_46] : memref<128x256xbf16, #tpu.memory_space<vmem>>, vector<128x256xbf16>
    %cst_47 = arith.constant dense<0.000000e+00> : vector<128x256xf32>
    %83 = tpu.matmul %81, %82, %cst_47 {dimension_numbers = #tpu.dot_dimension_numbers<[1], [0], [0], [1], [0, 0, 1, 1], [], []>} : vector<128x128xbf16>, vector<128x256xbf16>, vector<128x256xf32> -> vector<128x256xf32>
    %c0_48 = arith.constant 0 : index
    %c0_49 = arith.constant 0 : index
    %84 = vector.load %arg13[%c0_48, %c0_49] : memref<1x256xf32, #tpu.memory_space<vmem>>, vector<1x256xf32>
    %85 = vector.broadcast %84 : vector<1x256xf32> to vector<128x256xf32>
    %86 = arith.addf %83, %85 : vector<128x256xf32>
    %cst_50 = arith.constant 0.000000e+00 : f32
    %87 = vector.broadcast %cst_50 : f32 to vector<128x256xf32>
    %88 = arith.subf %87, %86 : vector<128x256xf32>
    %89 = math.exp %88 : vector<128x256xf32>
    %cst_51 = arith.constant 1.000000e+00 : f32
    %90 = vector.broadcast %cst_51 : f32 to vector<128x256xf32>
    %91 = arith.addf %90, %89 : vector<128x256xf32>
    %92 = tpu.reciprocal %91 {approx = true} : vector<128x256xf32> -> vector<128x256xf32>
    %c0_52 = arith.constant 0 : index
    %c0_53 = arith.constant 0 : index
    %93 = vector.load %arg14[%c0_52, %c0_53] : memref<128x256xf32, #tpu.memory_space<vmem>>, vector<128x256xf32>
    tpu.vector_store %arg14[%c0_52, %c0_53], %92 {strides = array<i32>} : memref<128x256xf32, #tpu.memory_space<vmem>>, vector<128x256xf32>,
    return
  }
  func.func @transform_0(%arg0: i32) -> (i32, i32) {
    %c0_i32 = arith.constant 0 : i32
    %c0_i32_0 = arith.constant 0 : i32
    return %arg0, %c0_i32 : i32, i32
  }
  func.func @transform_1(%arg0: i32) -> (i32, i32) {
    %c0_i32 = arith.constant 0 : i32
    %c0_i32_0 = arith.constant 0 : i32
    %c0_i32_1 = arith.constant 0 : i32
    return %c0_i32, %c0_i32_0 : i32, i32
  }
  func.func @transform_2(%arg0: i32) -> (i32, i32) {
    %c0_i32 = arith.constant 0 : i32
    %c0_i32_0 = arith.constant 0 : i32
    %c0_i32_1 = arith.constant 0 : i32
    return %c0_i32, %c0_i32_0 : i32, i32
  }
  func.func @transform_3(%arg0: i32) -> (i32, i32) {
    %c0_i32 = arith.constant 0 : i32
    %c0_i32_0 = arith.constant 0 : i32
    %c0_i32_1 = arith.constant 0 : i32
    return %c0_i32, %c0_i32_0 : i32, i32
  }
  func.func @transform_4(%arg0: i32) -> (i32, i32) {
    %c0_i32 = arith.constant 0 : i32
    %c0_i32_0 = arith.constant 0 : i32
    %c0_i32_1 = arith.constant 0 : i32
    return %c0_i32, %c0_i32_0 : i32, i32
  }
  func.func @transform_5(%arg0: i32) -> (i32, i32) {
    %c0_i32 = arith.constant 0 : i32
    %c0_i32_0 = arith.constant 0 : i32
    %c0_i32_1 = arith.constant 0 : i32
    return %c0_i32, %c0_i32_0 : i32, i32
  }
  func.func @transform_6(%arg0: i32) -> (i32, i32) {
    %c0_i32 = arith.constant 0 : i32
    %c0_i32_0 = arith.constant 0 : i32
    %c0_i32_1 = arith.constant 0 : i32
    return %c0_i32, %c0_i32_0 : i32, i32
  }
  func.func @transform_7(%arg0: i32) -> (i32, i32) {
    %c0_i32 = arith.constant 0 : i32
    %c0_i32_0 = arith.constant 0 : i32
    %c0_i32_1 = arith.constant 0 : i32
    return %c0_i32, %c0_i32_0 : i32, i32
  }
  func.func @transform_8(%arg0: i32) -> (i32, i32) {
    %c0_i32 = arith.constant 0 : i32
    %c0_i32_0 = arith.constant 0 : i32
    %c0_i32_1 = arith.constant 0 : i32
    return %c0_i32, %c0_i32_0 : i32, i32
  }
  func.func @transform_9(%arg0: i32) -> (i32, i32) {
    %c0_i32 = arith.constant 0 : i32
    %c0_i32_0 = arith.constant 0 : i32
    %c0_i32_1 = arith.constant 0 : i32
    return %c0_i32, %c0_i32_0 : i32, i32
  }
  func.func @transform_10(%arg0: i32) -> (i32, i32) {
    %c0_i32 = arith.constant 0 : i32
    %c0_i32_0 = arith.constant 0 : i32
    %c0_i32_1 = arith.constant 0 : i32
    return %c0_i32, %c0_i32_0 : i32, i32
  }
  func.func @transform_11(%arg0: i32) -> (i32, i32) {
    %c0_i32 = arith.constant 0 : i32
    %c0_i32_0 = arith.constant 0 : i32
    %c0_i32_1 = arith.constant 0 : i32
    return %c0_i32, %c0_i32_0 : i32, i32
  }
  func.func @transform_12(%arg0: i32) -> (i32, i32) {
    %c0_i32 = arith.constant 0 : i32
    %c0_i32_0 = arith.constant 0 : i32
    %c0_i32_1 = arith.constant 0 : i32
    return %c0_i32, %c0_i32_0 : i32, i32
  }
  func.func @transform_13(%arg0: i32) -> (i32, i32) {
    %c0_i32 = arith.constant 0 : i32
    %c0_i32_0 = arith.constant 0 : i32
    return %arg0, %c0_i32 : i32, i32
  }
}

</mosaic_0001>

<bundles_post_ra>
// kernel: tpu_custom_call.1
= control target key start
LH: loop header
LB: loop body
LE: loop exit
PB: predicated region body
PF: predicated region fallthrough
CT: control target
= control target key end

     0   :  { %s5153_s0 = inlined_call_operand.hbm [shape: f32[256,256], index: 0, kind: input, shape index: {}]   ;;  %s5154_s1 = inlined_call_operand.hbm [shape: bf16[256,128], index: 1, kind: input, shape index: {}]   ;;  %s5155_s2 = inlined_call_operand.hbm [shape: bf16[128,128], index: 2, kind: input, shape index: {}]   ;;  %s5156_s3 = inlined_call_operand.hbm [shape: bf16[128,256], index: 3, kind: input, shape index: {}]   ;;  %s5157_s4 = inlined_call_operand.hbm [shape: bf16[128,256], index: 4, kind: input, shape index: {}]   ;;  %s5158_s5 = inlined_call_operand.hbm [shape: bf16[128,128], index: 5, kind: input, shape index: {}]   ;;  %s5159_s6 = inlined_call_operand.hbm [shape: bf16[256,128], index: 6, kind: input, shape index: {}]   ;;  %s5160_s7 = inlined_call_operand.vmem [shape: f32[1,128], index: 7, kind: input, shape index: {}]   ;;  %s5161_s8 = inlined_call_operand.vmem [shape: f32[1,128], index: 8, kind: input, shape index: {}]   ;;  %s5162_s9 = inlined_call_operand.vmem [shape: f32[1,256], index: 9, kind: input, shape index: {}]   ;;  %s5163_s10 = inlined_call_operand.vmem [shape: f32[1,128], index: 10, kind: input, shape index: {}]   ;;  %s5164_s11 = inlined_call_operand.vmem [shape: f32[1,128], index: 11, kind: input, shape index: {}]   ;;  %s5165_s12 = inlined_call_operand.vmem [shape: f32[1,256], index: 12, kind: input, shape index: {}]   ;;  %s5166_s13 = inlined_call_operand.hbm [shape: f32[256,256], index: 13, kind: output, shape index: {}]  }
   0x1   :  { %5174 = sst [smem:[#allocation20_spill]] %s5154_s1 }
   0x2   :  { %5175 = sst [smem:[#allocation21_spill]] %s5155_s2 }
   0x3   :  { %5176 = sst [smem:[#allocation22_spill]] %s5156_s3 }
   0x4   :  { %5177 = sst [smem:[#allocation23_spill]] %s5157_s4 }
   0x5   :  { %5178 = sst [smem:[#allocation24_spill]] %s5158_s5 }
   0x6   :  { %5179 = sst [smem:[#allocation25_spill]] %s5159_s6 }
   0x7   :  { %5180 = sst [smem:[#allocation26_spill]] %s5166_s13 }
   0x8   :  { %18 = vsyncpa [#allocation3], 0 }
   0x9   :  { %20 = vsyncpa [#allocation3 + $0x1], 0 }
   0xa   :  { %21 = vsyncpa [#allocation6], 0 }
   0xb   :  { %22 = vsyncpa [#allocation9], 0 }
   0xc   :  { %23 = vsyncpa [#allocation12], 0 }
   0xd   :  { %24 = vsyncpa [#allocation4], 0 }
   0xe   :  { %26 = vsyncpa [#allocation4 + $0x1], 0  ;;  %s4230_s25 = smov 0   ;;  %s4232_s26 = smov 0  }
   0xf   :  { %s4234_s27 = smov 0   ;;  %s4236_s28 = smov 0  }
  0x10 LB: > { %s4143_s29 = smov [#allocation5]   ;;  %s4251_s14 = sadd.s32 4294967295, %s4141_s28   ;;  %s4141_s28 = sphi %s4236_s28, %s5212_s28   ;;  %s4137_s27 = sphi %s4234_s27, %s5211_s27   ;;  %s4133_s26 = sphi %s4232_s26, %s5210_s26   ;;  %s4129_s25 = sphi %s4230_s25, %s5209_s25  }
  0x11   : > { %s353_s30 = sshll.u32 %s4143_s29, 4  ;;  %p2898_p0 = scmp.ge.s32.totalorder %s4141_s28, 1  ;;  %s354_s30 = int_to_ptr.vmem [resolvable:$true] %s353_s30 }
  0x12   : > { %p5170_p1 = scmp.eq.s32.totalorder %s4251_s14, 0  ;;  %p341_p2 = scmp.lt.s32.totalorder %s4141_s28, 3 }
  0x13   : > { %s4144_s16 = smov [#allocation8]   ;;  %s4145_s19 = smov [#allocation11]  }
  0x14   : > { %p4256_p3 = pnand %p2898_p0, %p341_p2  ;;  %s379_s17 = sshll.u32 %s4144_s16, 4  ;;  %s4269_s17 = int_to_ptr.vmem [resolvable:$true] %s379_s17 }
  0x15   : > { %s4271_s20 = sshll.u32 %s4145_s19, 4  ;;  %s3892_s22 = scalar_lea.vmem %s354_s30, 2048  ;;  %s406_s20 = int_to_ptr.vmem [resolvable:$true] %s4271_s20 }
  0x16   : > { %s5181_s15 = scalar_select %p4256_p3, 1, 0 }
  0x17   : > { %p3377_p5 = pneg %p4256_p3  ;;  %p3893_p8 = scmp.ne.s32.totalorder %s354_s30, %s3892_s22 }
  0x18   : > { %p3900_p11 = scmp.lt.s32.totalorder %s354_s30, %s354_s30  ;;  %p3901_p12 = scmp.lt.s32.totalorder %s3892_s22, %s3892_s22 }
  0x19   : > { %p4265_p6 = pnand %p3377_p5, %p5170_p1 }
  0x1a   : > { %p3902_p13 = por %p3901_p12, %p3900_p11 }
  0x1b   : > { %p4275_p7 = pneg %p4265_p6 }
  0x1d   : > { %p3895_p9 = pnand %p3893_p8, %p4275_p7 }
  0x1f   : > { %p3896_p10 = pneg %p3895_p9 }
  0x21   : > { %p3903_p0 = pnand %p3902_p13, %p3896_p10 }
  0x23   : > { %3906 = shalt.err (!%p3903_p0)
}
  0x24   : > { %s4146_s23 = smov 64   ;;  %s4147_s24 = smov 4  }
  0x25   : > { %s5184_s1 = sld [smem:[#allocation20_spill]]  ;;  %s3918_s19 = scalar_lea.vmem %s4269_s17, 2048 }
  0x26   : > { %p3919_p2 = scmp.ne.s32.totalorder %s4269_s17, %s3918_s19  ;;  %p3926_p9 = scmp.lt.s32.totalorder %s4269_s17, %s4269_s17 }
  0x27   : > { %p3927_p10 = scmp.lt.s32.totalorder %s3918_s19, %s3918_s19 }
  0x28   : > { %p3921_p5 = pnand %p3919_p2, %p4275_p7 }
  0x29   : > { %p3928_p11 = por %p3927_p10, %p3926_p9 }
  0x2a   : > { %p3922_p8 = pneg %p3921_p5 }
  0x2b   : > { %3380 = dma.hbm_to_vmem [thread:$0]  (!%p4265_p6), %s5184_s1, 2048, %s354_s30, [#allocation6], %s4146_s23, %s4146_s23, %s4147_s24  }
  0x2c   : > { %p3929_p12 = pnand %p3928_p11, %p3922_p8 }
  0x2e   : > { %3932 = shalt.err (!%p3929_p12)
}
  0x2f   : > { %s5168_s22 = smov 128   ;;  %s5169_s13 = smov 8  }
  0x30   : > { %s5185_s3 = sld [smem:[#allocation22_spill]]  ;;  %s3944_s16 = scalar_lea.vmem %s406_s20, 1024 }
  0x31   : > { %p3945_p13 = scmp.ne.s32.totalorder %s406_s20, %s3944_s16  ;;  %p3952_p5 = scmp.lt.s32.totalorder %s406_s20, %s406_s20 }
  0x32   : > { %p3953_p8 = scmp.lt.s32.totalorder %s3944_s16, %s3944_s16 }
  0x33   : > { %p3947_p0 = pnand %p3945_p13, %p4275_p7 }
  0x34   : > { %p3954_p9 = por %p3953_p8, %p3952_p5 }
  0x35   : > { %p3948_p2 = pneg %p3947_p0 }
  0x36   : > { %3386 = dma.hbm_to_vmem [thread:$0]  (!%p4265_p6), %s5185_s3, 2048, %s4269_s17, [#allocation9], %s5168_s22, %s5168_s22, %s5169_s13  }
  0x37   : > { %p3955_p10 = pnand %p3954_p9, %p3948_p2 }
  0x39   : > { %3958 = shalt.err (!%p3955_p10)
}
  0x3a   : > { %s5186_s5 = sld [smem:[#allocation24_spill]]  ;;  %s4150_s17 = smov [#allocation7]  }
  0x3b   : > { %s366_s30 = sshll.u32 %s4150_s17, 4  ;;  %s4151_s29 = smov [#allocation10]   ;;  %s367_s30 = int_to_ptr.vmem [resolvable:$true] %s366_s30 }
  0x3c   : > { %s392_s22 = sshll.u32 %s4151_s29, 4  ;;  %s3970_s13 = scalar_lea.vmem %s367_s30, 1024  ;;  %s393_s22 = int_to_ptr.vmem [resolvable:$true] %s392_s22 }
  0x3d   : > { %p3971_p11 = scmp.ne.s32.totalorder %s367_s30, %s3970_s13  ;;  %p3978_p0 = scmp.lt.s32.totalorder %s367_s30, %s367_s30 }
  0x3e   : > { %p3979_p2 = scmp.lt.s32.totalorder %s3970_s13, %s3970_s13 }
  0x3f   : > { %p3973_p12 = pnand %p3971_p11, %p4275_p7 }
  0x40   : > { %3392 = dma.hbm_to_vmem [thread:$0]  (!%p4265_p6), %s5186_s5, 1024, %s406_s20, [#allocation12], %s4146_s23, %s4146_s23, %s4147_s24  }
  0x41   : > { %p3974_p13 = pneg %p3973_p12  ;;  %p3980_p5 = por %p3979_p2, %p3978_p0 }
  0x43   : > { %p3981_p8 = pnand %p3980_p5, %p3974_p13 }
  0x45   : > { %3984 = shalt.err (!%p3981_p8)
}
  0x46   : > { %s5187_s2 = sld [smem:[#allocation21_spill]]  ;;  %s3996_s16 = scalar_lea.vmem %s393_s22, 2048 }
  0x47   : > { %p3997_p9 = scmp.ne.s32.totalorder %s393_s22, %s3996_s16  ;;  %p4004_p12 = scmp.lt.s32.totalorder %s393_s22, %s393_s22 }
  0x48   : > { %p4005_p0 = scmp.lt.s32.totalorder %s3996_s16, %s3996_s16 }
  0x49   : > { %p3999_p10 = pnand %p3997_p9, %p4275_p7 }
  0x4a   : > { %p4006_p13 = por %p4005_p0, %p4004_p12 }
  0x4b   : > { %p4000_p11 = pneg %p3999_p10 }
  0x4c   : > { %3383 = dma.hbm_to_vmem [thread:$0]  (!%p4265_p6), %s5187_s2, 1024, %s367_s30, [#allocation6], %s4146_s23, %s4146_s23, %s4147_s24  }
  0x4d   : > { %p4007_p2 = pnand %p4006_p13, %p4000_p11 }
  0x4f   : > { %4010 = shalt.err (!%p4007_p2)
}
  0x50   : > { %s5188_s13 = smov 8   ;;  %s5189_s19 = smov 128  }
  0x51   : > { %s5190_s4 = sld [smem:[#allocation23_spill]]  ;;  %s4152_s30 = smov [#allocation13]  }
  0x52   : > { %s418_s1 = sshll.u32 %s4152_s30, 4  ;;  %s419_s1 = int_to_ptr.vmem [resolvable:$true] %s418_s1 }
  0x53   : > { %s4022_s20 = scalar_lea.vmem %s419_s1, 2048  ;;  %p4030_p10 = scmp.lt.s32.totalorder %s419_s1, %s419_s1 }
  0x54   : > { %p4023_p5 = scmp.ne.s32.totalorder %s419_s1, %s4022_s20  ;;  %p4031_p11 = scmp.lt.s32.totalorder %s4022_s20, %s4022_s20 }
  0x56   : > { %p4025_p8 = pnand %p4023_p5, %p4275_p7  ;;  %p4032_p12 = por %p4031_p11, %p4030_p10 }
  0x57   : > { %3389 = dma.hbm_to_vmem [thread:$0]  (!%p4265_p6), %s5190_s4, 2048, %s393_s22, [#allocation9], %s5189_s19, %s5189_s19, %s5188_s13  }
  0x58   : > { %p4026_p9 = pneg %p4025_p8 }
  0x5a   : > { %p4033_p0 = pnand %p4032_p12, %p4026_p9 }
  0x5c   : > { %4036 = shalt.err (!%p4033_p0)
}
  0x5d   : > { %s5191_s6 = sld [smem:[#allocation25_spill]]  ;;  %s2897_s18 = sadd.s32 4294967294, %s4141_s28  }
  0x5e   : > { %s4347_s21 = sadd.s32 1, %s4141_s28   ;;  %s39_s19 = sadd.s32 1, %s4137_s27 }
  0x5f   : > { %s36_s13 = ssub.s32 %s4141_s28, %s4347_s21  ;;  %p46_p13 = scmp.ne.s32.totalorder %s4137_s27, %s4133_s26 }
  0x60   : > { %p37_p7 = scmp.eq.s32.totalorder %s36_s13, 0  ;;  %p47_p2 = scmp.eq.s32.totalorder %s4141_s28, 0 }
  0x61   : > { %p52_p5 = scmp.ne.s32.totalorder %s4133_s26, %s4129_s25  ;;  %p328_p9 = scmp.eq.s32.totalorder %s4251_s14, 1 }
  0x62   : > { %s4358_s17 = scalar_select %p37_p7, %s4137_s27, %s39_s19  }
  0x63   : > { %3395 = dma.hbm_to_vmem [thread:$0]  (!%p4265_p6), %s5191_s6, 2048, %s419_s1, [#allocation12], %s4146_s23, %s4146_s23, %s4147_s24  }
  0x64   : > { %p4360_p8 = por %p47_p2, %p46_p13  ;;  %p4366_p6 = por %p5170_p1, %p52_p5 }
  0x65   : > { %p334_p10 = scmp.eq.s32.totalorder %s2897_s18, 1  ;;  %p3410_p11 = scmp.lt.s32.totalorder %s4141_s28, 2 }
  0x66   : > { %s5193_s23 = scalar_select %p4366_p6, 1, 0 }
  0x67   : > { %s450_s24 = sand.u32 1, %s4137_s27   ;;  %p4373_p12 = por %p328_p9, %p46_p13 }
  0x68   : > { %p4377_p0 = por %p334_p10, %p52_p5  ;;  %s2906_s20 = sshll.u32 %s450_s24, 8 }
  0x69   : > { %s5194_s30 = scalar_select %p4373_p12, 1, 0 }
  0x6a   : > { %s5195_s1 = scalar_select %p4377_p0, 1, 0 }
  0x6b   : > { %s3106_s16 = sshll.u32 %s4141_s28, 12  ;;  %s454_s18 = scalar_lea.vmem [#allocation2], %s2906_s20 }
  0x6c   : > { %s4385_s19 = scalar_lea.hbm %s5153_s0, %s3106_s16  ;;  %s462_s2 = sshll.u32 %s454_s18, 4  ;;  %s4387_s2 = int_to_ptr.vmem [resolvable:$true] %s462_s2 }
  0x6d   : > { %p4391_p7 = pnand %p3410_p11, %p4360_p8  ;;  %s4395_s4 = scalar_lea.sflag [#allocation3], %s450_s24 }
  0x6e   : > { %s4037_s5 = scalar_lea.hbm %s4385_s19, 4096  ;;  %s4042_s20 = scalar_lea.hbm %s5153_s0, 8192 }
  0x6f   : > { %p4038_p13 = scmp.ne.s32.totalorder %s4385_s19, %s4037_s5  ;;  %p4039_p2 = pneg %p4391_p7 }
  0x70   : > { %p4043_p8 = scmp.lt.s32.totalorder %s4385_s19, %s5153_s0  ;;  %p4044_p10 = scmp.lt.s32.totalorder %s4042_s20, %s4037_s5 }
  0x71   : > { %p4040_p5 = pnand %p4039_p2, %p4038_p13 }
  0x72   : > { %p4045_p11 = por %p4044_p10, %p4043_p8 }
  0x73   : > { %p4041_p9 = pneg %p4040_p5 }
  0x75   : > { %p4046_p4 = pnand %p4045_p11, %p4041_p9 }
  0x77   : > { %4049 = shalt.err (!%p4046_p4)
}
  0x78   : > { %s4050_s29 = scalar_lea.vmem %s4387_s2, 4096  ;;  %s4153_s24 = smov [#allocation2]  }
  0x79   : > { %p4051_p1 = scmp.ne.s32.totalorder %s4387_s2, %s4050_s29  ;;  %s4055_s6 = sshll.u32 %s4153_s24, 4  ;;  %s4056_s6 = int_to_ptr.vmem [resolvable:$false] %s4055_s6 }
  0x7a   : > { %s4057_s16 = scalar_lea.vmem %s4056_s6, 8192  ;;  %p4058_p5 = scmp.lt.s32.totalorder %s4387_s2, %s4056_s6 }
  0x7b   : > { %p4053_p0 = pnand %p4051_p1, %p4039_p2  ;;  %p4059_p12 = scmp.lt.s32.totalorder %s4057_s16, %s4050_s29 }
  0x7d   : > { %p4054_p13 = pneg %p4053_p0  ;;  %p4060_p6 = por %p4059_p12, %p4058_p5 }
  0x7f   : > { %p4061_p3 = pnand %p4060_p6, %p4054_p13 }
  0x81   : > { %4064 = shalt.err (!%p4061_p3)
}
  0x82   : > { %s4154_s5 = smov 256   ;;  %s4155_s22 = smov 16  }
  0x83   : > { %3399 = dma.hbm_to_vmem [thread:$0]  (!%p4391_p7), %s4385_s19, 4096, %s4387_s2, %s4395_s4, %s4154_s5, %s4154_s5, %s4155_s22  }
  0x84   : > { %p5197_p1 = scmp.ne.s32.totalorder %s5181_s15, 0 }
  0x85   : > { %s4419_s20 = sand.u32 (!%p5197_p1), 1, %s4133_s26   ;;  %p5198_p3 = scmp.ne.s32.totalorder (!%p5197_p1), %s5193_s23, 0 }
  0x86   : > { %474 = sbr.rel (%p5197_p1) target bundleno = 1648 (0x670), region = 72  ;;  %s2911_s6 = sshll.u32 (!%p5197_p1), %s4419_s20, 8 }
  0x87   : > { %s477_s13 = scalar_lea.sflag (!%p5197_p1), [#allocation3], %s4419_s20  ;;  %s4425_s18 = scalar_lea.vmem (!%p5197_p1), [#allocation2], %s2911_s6 }
  0x8b   : > { %4108 = dma.done.wait (%p5198_p3), %s477_s13, 4096  }
  0x8c   : > { %4110 = vsyncadd (%p5198_p3), %s477_s13, 4294963200  ;;  %p5199_p4 = scmp.eq.s32.totalorder %s4251_s14, 0 }
  0x8e   : > { %4112 = dma.done.wait (%p5199_p4), [#allocation6], 3072   ;;  %p5200_p6 = pmov %p5199_p4 }
  0x8f   : > { %p5201_p12 = pmov %p5199_p4 }
  0x90   : > { %4114 = vsyncadd (%p5200_p6), [#allocation6], 4294964224 }
  0x91   : > { %4116 = dma.done.wait (%p5201_p12), [#allocation9], 4096   ;;  %p5202_p0 = pmov %p5199_p4 }
  0x93   : > { %4118 = vsyncadd (%p5202_p0), [#allocation9], 4294963200  ;;  %p5203_p7 = pmov %p5202_p0 }
  0x94   : > { %p5204_p2 = pmov %p5202_p0 }
  0x95   : > { %4120 = dma.done.wait (%p5203_p7), [#allocation12], 3072  }
  0x96   : > { %4122 = vsyncadd (%p5204_p2), [#allocation12], 4294964224  ;;  %v3465_v0 = vld [vmem:[#allocation5 + $0x78] sm:$0xff]   ;;  %v3467_v2 = vld [vmem:[#allocation5 + $0x70] sm:$0xff]   ;;  %s5205_s15 = sld [smem:[#allocation26_spill]]  ;;  %s2753_s19 = scalar_lea.sflag [#allocation4], %s4419_s20 }
  0x97   : > { %v3466_v1 = vld [vmem:[#allocation5 + $0x38] sm:$0xff]   ;;  %3109 = vmatprep.subr.bf16.mxu0 %v3465_v0  ;;  %3333 = vmatprep.subr.bf16.mxu1 %v3465_v0  ;;  %v3468_v3 = vld [vmem:[#allocation5 + $0x30] sm:$0xff]   ;;  %v3469_v4 = vld [vmem:[#allocation5 + $0x68] sm:$0xff]   ;;  %p5206_p8 = scmp.ne.s32.totalorder %s5194_s30, 0 }
  0x98   : > { %3110 = vmatpush3.bf16.msra.mxu0 %v3466_v1  ;;  %3341 = vmatpush3.bf16.msra.mxu1 %v3466_v1  ;;  %v3470_v5 = vld [vmem:[#allocation5 + $0x28] sm:$0xff]   ;;  %v3471_v6 = vld [vmem:[#allocation5 + $0x60] sm:$0xff]   ;;  %v3473_v8 = vld [vmem:[#allocation5 + $0x58] sm:$0xff]  }
  0x99   : > { %3111 = vmatprep.subr.bf16.mxu0 %v3467_v2  ;;  %3334 = vmatprep.subr.bf16.mxu1 %v3467_v2  ;;  %v3472_v7 = vld [vmem:[#allocation5 + $0x20] sm:$0xff]   ;;  %v3474_v9 = vld [vmem:[#allocation5 + $0x18] sm:$0xff]   ;;  %v3475_v10 = vld [vmem:[#allocation5 + $0x50] sm:$0xff]  }
  0x9a   : > { %v551_v11 = vld [vmem:[%s4425_s18 + $0x8] sm:$0xff]  ;;  %v553_v12 = vld [vmem:[%s4425_s18 + $0x18] sm:$0xff]  ;;  %v3476_v17 = vld [vmem:[#allocation5 + $0x10] sm:$0xff]  }
  0x9b   : > { %v583_v13 = vpack.c.bf16 %v553_v12, %v551_v11  ;;  %v567_v14 = vld [vmem:[%s4425_s18 + $0x88] sm:$0xff]  ;;  %v569_v15 = vld [vmem:[%s4425_s18 + $0x98] sm:$0xff]  ;;  %v3479_v20 = vld [vmem:[#allocation5 + $0x40] sm:$0xff]  }
  0x9c   : > { %3112 = vmatpush3.bf16.msra.mxu0 %v3468_v3  ;;  %3342 = vmatpush3.bf16.msra.mxu1 %v3468_v3  ;;  %v591_v16 = vpack.c.bf16 %v569_v15, %v567_v14  ;;  %v3477_v18 = vld [vmem:[#allocation5 + $0x48] sm:$0xff]   ;;  %v3480_v21 = vld [vmem:[#allocation5] sm:$0xff]   ;;  %v552_v23 = vld [vmem:[%s4425_s18 + $0x10] sm:$0xff] }
  0x9d   : > { %3113 = vmatprep.subr.bf16.mxu0 %v3469_v4  ;;  %3335 = vmatprep.subr.bf16.mxu1 %v3469_v4  ;;  %v3478_v19 = vld [vmem:[#allocation5 + $0x8] sm:$0xff]   ;;  %v550_v22 = vld [vmem:[%s4425_s18] sm:$0xff]  ;;  %v568_v25 = vld [vmem:[%s4425_s18 + $0x90] sm:$0xff] }
  0x9e   : > { %765 = vmatprep.mubr.bf16.mxu0 %v583_v13  ;;  %797 = vmatprep.mubr.bf16.mxu1 %v591_v16  ;;  %v566_v24 = vld [vmem:[%s4425_s18 + $0x80] sm:$0xff]  ;;  %v555_v26 = vld [vmem:[%s4425_s18 + $0x28] sm:$0xff]  ;;  %v557_v27 = vld [vmem:[%s4425_s18 + $0x38] sm:$0xff]  ;;  %v582_v30 = vpack.c.bf16 %v552_v23, %v550_v22 }
  0x9f   : > { %v571_v28 = vld [vmem:[%s4425_s18 + $0xa8] sm:$0xff]  ;;  %v573_v29 = vld [vmem:[%s4425_s18 + $0xb8] sm:$0xff]  ;;  %v590_v31 = vpack.c.bf16 %v568_v25, %v566_v24  ;;  %v585_v32 = vpack.c.bf16 %v557_v27, %v555_v26  ;;  %v554_v34 = vld [vmem:[%s4425_s18 + $0x20] sm:$0xff] }
  0xa0   : > { %3114 = vmatpush3.bf16.msra.mxu0 %v3470_v5  ;;  %3343 = vmatpush3.bf16.msra.mxu1 %v3470_v5  ;;  %v593_v33 = vpack.c.bf16 %v573_v29, %v571_v28  ;;  %v556_v35 = vld [vmem:[%s4425_s18 + $0x30] sm:$0xff]  ;;  %v570_v36 = vld [vmem:[%s4425_s18 + $0xa0] sm:$0xff]  ;;  %v559_v38 = vld [vmem:[%s4425_s18 + $0x48] sm:$0xff] }
  0xa1   : > { %3115 = vmatprep.subr.bf16.mxu0 %v3471_v6  ;;  %3336 = vmatprep.subr.bf16.mxu1 %v3471_v6  ;;  %v572_v37 = vld [vmem:[%s4425_s18 + $0xb0] sm:$0xff]  ;;  %v561_v39 = vld [vmem:[%s4425_s18 + $0x58] sm:$0xff]  ;;  %v575_v40 = vld [vmem:[%s4425_s18 + $0xc8] sm:$0xff]  ;;  %v584_v42 = vpack.c.bf16 %v556_v35, %v554_v34 }
  0xa2   : > { %v577_v41 = vld [vmem:[%s4425_s18 + $0xd8] sm:$0xff]  ;;  %v592_v43 = vpack.c.bf16 %v572_v37, %v570_v36  ;;  %v587_v44 = vpack.c.bf16 %v561_v39, %v559_v38  ;;  %v558_v46 = vld [vmem:[%s4425_s18 + $0x40] sm:$0xff]  ;;  %v560_v47 = vld [vmem:[%s4425_s18 + $0x50] sm:$0xff] }
  0xa3   : > { %v595_v45 = vpack.c.bf16 %v577_v41, %v575_v40  ;;  %v574_v48 = vld [vmem:[%s4425_s18 + $0xc0] sm:$0xff]  ;;  %v576_v49 = vld [vmem:[%s4425_s18 + $0xd0] sm:$0xff]  ;;  %v563_v50 = vld [vmem:[%s4425_s18 + $0x68] sm:$0xff]  ;;  %v586_v54 = vpack.c.bf16 %v560_v47, %v558_v46 }
  0xa4   : > { %3116 = vmatpush3.bf16.msra.mxu0 %v3472_v7  ;;  %3344 = vmatpush3.bf16.msra.mxu1 %v3472_v7  ;;  %v565_v51 = vld [vmem:[%s4425_s18 + $0x78] sm:$0xff]  ;;  %v579_v52 = vld [vmem:[%s4425_s18 + $0xe8] sm:$0xff]  ;;  %v594_v55 = vpack.c.bf16 %v576_v49, %v574_v48  ;;  %v562_v58 = vld [vmem:[%s4425_s18 + $0x60] sm:$0xff] }
  0xa5   : > { %3117 = vmatprep.subr.bf16.mxu0 %v3473_v8  ;;  %3337 = vmatprep.subr.bf16.mxu1 %v3473_v8  ;;  %v581_v53 = vld [vmem:[%s4425_s18 + $0xf8] sm:$0xff]  ;;  %v589_v56 = vpack.c.bf16 %v565_v51, %v563_v50  ;;  %v564_v59 = vld [vmem:[%s4425_s18 + $0x70] sm:$0xff]  ;;  %v578_v60 = vld [vmem:[%s4425_s18 + $0xe0] sm:$0xff] }
  0xa6   : > { %v597_v57 = vpack.c.bf16 %v581_v53, %v579_v52  ;;  %v580_v61 = vld [vmem:[%s4425_s18 + $0xf0] sm:$0xff]  ;;  %v588_v62 = vpack.c.bf16 %v564_v59, %v562_v58  ;;  %v3481_v0 = vld [vmem:[#allocation7 + $0x38] sm:$0xff]   ;;  %v3483_v2 = vld [vmem:[#allocation7 + $0x28] sm:$0xff]   ;;  %s5052_s18 = scalar_lea.vmem [#allocation14], %s2911_s6  ;;  %s3108_s6 = sshll.u32 %s4251_s14, 12 }
  0xa7   : > { %v596_v63 = vpack.c.bf16 %v580_v61, %v578_v60  ;;  %v3482_v1 = vld [vmem:[#allocation7 + $0x30] sm:$0xff]   ;;  %v3484_v3 = vld [vmem:[#allocation7 + $0x20] sm:$0xff]   ;;  %v3485_v4 = vld [vmem:[#allocation7 + $0x18] sm:$0xff]   ;;  %s2767_s2 = sshll.u32 %s5052_s18, 4  ;;  %s5106_s23 = scalar_lea.hbm %s5205_s15, %s3108_s6  ;;  %s5108_s2 = int_to_ptr.vmem [resolvable:$true] %s2767_s2 }
  0xa8   : > { %3118 = vmatpush3.bf16.msra.mxu0 %v3474_v9  ;;  %3345 = vmatpush3.bf16.msra.mxu1 %v3474_v9  ;;  %v3486_v5 = vld [vmem:[#allocation7 + $0x10] sm:$0xff]   ;;  %v3487_v6 = vld [vmem:[#allocation7 + $0x8] sm:$0xff]   ;;  %v3488_v7 = vld [vmem:[#allocation7] sm:$0xff]   ;;  %s4065_s29 = scalar_lea.vmem %s5108_s2, 4096  ;;  %s4157_s14 = smov [#allocation14]  }
  0xa9   : > { %3119 = vmatprep.subr.bf16.mxu0 %v3475_v10  ;;  %3338 = vmatprep.subr.bf16.mxu1 %v3475_v10  ;;  %v4478_v10 = vld [vmem:[%s5160_s7] ss:$0 sm:$0xff]  ;;  %p4066_p9 = scmp.ne.s32.totalorder %s5108_s2, %s4065_s29  ;;  %s4069_s24 = sshll.u32 %s4157_s14, 4  ;;  %s4070_s24 = int_to_ptr.vmem [resolvable:$false] %s4069_s24 }
  0xaa   : > { %s4071_s16 = scalar_lea.vmem %s4070_s24, 8192  ;;  %p4072_p13 = scmp.lt.s32.totalorder %s5108_s2, %s4070_s24 }
  0xab   : > { %p4067_p10 = pnand %p4066_p9, %p5206_p8  ;;  %p4073_p5 = scmp.lt.s32.totalorder %s4071_s16, %s4065_s29 }
  0xac   : > { %3120 = vmatpush3.bf16.msra.mxu0 %v3476_v17  ;;  %3346 = vmatpush3.bf16.msra.mxu1 %v3476_v17 }
  0xad   : > { %3121 = vmatprep.subr.bf16.mxu0 %v3477_v18  ;;  %3339 = vmatprep.subr.bf16.mxu1 %v3477_v18  ;;  %p4068_p11 = pneg %p4067_p10  ;;  %p4074_p1 = por %p4073_p5, %p4072_p13 }
  0xaf   : > { %p4075_p3 = pnand %p4074_p1, %p4068_p11 }
  0xb0   : > { %3122 = vmatpush3.bf16.msra.mxu0 %v3478_v19  ;;  %3347 = vmatpush3.bf16.msra.mxu1 %v3478_v19 }
  0xb1   : > { %3123 = vmatprep.subr.bf16.mxu0 %v3479_v20  ;;  %3340 = vmatprep.subr.bf16.mxu1 %v3479_v20 }
  0xb4   : > { %3124 = vmatpush3.bf16.msra.mxu0 %v3480_v21  ;;  %3348 = vmatpush3.bf16.msra.mxu1 %v3480_v21 }
  0xb5   : > { %3269 = vmatprep.subr.bf16.mxu1 %v3481_v0 }
  0xb7   : > { %766 = vmatmul.mubr.bf16.vlgmr.msra.gmra.mxu0 %v582_v30  ;;  %798 = vmatmul.mubr.bf16.vlgmr.msra.gmra.mxu1 %v590_v31 }
  0xb8   : > { %773 = vmatprep.mubr.bf16.mxu0 %v585_v32  ;;  %805 = vmatprep.mubr.bf16.mxu1 %v593_v33 }
  0xb9   : > { %3270 = vmatpush3.bf16.msra.mxu1 %v3481_v0 }
  0xba   : > { %3271 = vmatprep.subr.bf16.mxu1 %v3482_v1 }
  0xbd   : > { %3272 = vmatpush3.bf16.msra.mxu1 %v3482_v1 }
  0xbe   : > { %3273 = vmatprep.subr.bf16.mxu1 %v3483_v2 }
  0xbf   : > { %774 = vmatmul.mubr.bf16.gmra.mxu0 %v584_v42  ;;  %806 = vmatmul.mubr.bf16.gmra.mxu1 %v592_v43 }
  0xc0   : > { %781 = vmatprep.mubr.bf16.mxu0 %v587_v44  ;;  %813 = vmatprep.mubr.bf16.mxu1 %v595_v45 }
  0xc1   : > { %3274 = vmatpush3.bf16.msra.mxu1 %v3483_v2 }
  0xc2   : > { %3275 = vmatprep.subr.bf16.mxu1 %v3484_v3 }
  0xc5   : > { %3276 = vmatpush3.bf16.msra.mxu1 %v3484_v3 }
  0xc6   : > { %3277 = vmatprep.subr.bf16.mxu1 %v3485_v4 }
  0xc7   : > { %782 = vmatmul.mubr.bf16.gmra.mxu0 %v586_v54  ;;  %814 = vmatmul.mubr.bf16.gmra.mxu1 %v594_v55 }
  0xc8   : > { %789 = vmatprep.mubr.bf16.mxu0 %v589_v56  ;;  %821 = vmatprep.mubr.bf16.mxu1 %v597_v57 }
  0xc9   : > { %3278 = vmatpush3.bf16.msra.mxu1 %v3485_v4 }
  0xca   : > { %3279 = vmatprep.subr.bf16.mxu1 %v3486_v5 }
  0xcd   : > { %3280 = vmatpush3.bf16.msra.mxu1 %v3486_v5 }
  0xce   : > { %3281 = vmatprep.subr.bf16.mxu1 %v3487_v6 }
  0xcf   : > { %790 = vmatmul.mubr.bf16.gmra.mxu0 %v588_v62  ;;  %822 = vmatmul.mubr.bf16.gmra.mxu1 %v596_v63 }
  0xd1   : > { %3282 = vmatpush3.bf16.msra.mxu1 %v3487_v6 }
  0xd2   : > { %3283 = vmatprep.subr.bf16.mxu1 %v3488_v7 }
  0xd5   : > { %3284 = vmatpush3.bf16.msra.mxu1 %v3488_v7 }
 0x177   : > { %v3125_v8 = vpop.f32.mrf.mxu0  ;;  %v3149_v9 = vpop.f32.mrf.mxu1 }
 0x179   : > { %v3126_v11 = vpop.f32.mrf.mxu0  ;;  %v3150_v12 = vpop.f32.mrf.mxu1 }
 0x17a   : > { %v3127_v13 = vadd.f32 %v3126_v11, %v3125_v8  ;;  %v3151_v28 = vadd.f32 %v3150_v12, %v3149_v9 }
 0x17b   : > { %v3128_v14 = vpop.f32.mrf.mxu0  ;;  %v3152_v15 = vpop.f32.mrf.mxu1 }
 0x17c   : > { %v4481_v16 = vadd.f32 %v3127_v13, %v4478_v10  ;;  %v4493_v37 = vadd.f32 %v3151_v28, %v4478_v10 }
 0x17d   : > { %v3129_v17 = vpop.f32.mrf.mxu0  ;;  %v3153_v18 = vpop.f32.mrf.mxu1 }
 0x17e   : > { %v846_v19 = vmul.f32 1.442695, %v4481_v16  ;;  %v3130_v20 = vadd.f32 %v3129_v17, %v3128_v14  ;;  %v3154_v32 = vadd.f32 %v3153_v18, %v3152_v15  ;;  %v862_v47 = vmul.f32 1.442695, %v4493_v37 }
 0x17f   : > { %v3131_v21 = vpop.f32.mrf.mxu0  ;;  %v3155_v22 = vpop.f32.mrf.mxu1  ;;  %vm830_vm0 = vcmp.gt.f32.partialorder %v4481_v16, 0.0  ;;  %vm838_vm6 = vcmp.gt.f32.partialorder %v4493_v37, 0.0 }
 0x180   : > { %3561 = vpow2.f32 %v846_v19  ;;  %v4485_v23 = vadd.f32 %v3130_v20, %v4478_v10  ;;  %v4499_v41 = vadd.f32 %v3154_v32, %v4478_v10 }
 0x181   : > { %v3132_v24 = vpop.f32.mrf.mxu0  ;;  %v3156_v25 = vpop.f32.mrf.mxu1 }
 0x182   : > { %v848_v26 = vmul.f32 1.442695, %v4485_v23  ;;  %v3133_v27 = vadd.f32 %v3132_v24, %v3131_v21  ;;  %v3157_v45 = vadd.f32 %v3156_v25, %v3155_v22  ;;  %v864_v53 = vmul.f32 1.442695, %v4499_v41 }
 0x183   : > { %v3134_v29 = vpop.f32.mrf.mxu0  ;;  %v3158_v30 = vpop.f32.mrf.mxu1  ;;  %vm831_vm1 = vcmp.gt.f32.partialorder %v4485_v23, 0.0  ;;  %vm839_vm7 = vcmp.gt.f32.partialorder %v4499_v41, 0.0 }
 0x184   : > { %3563 = vpow2.f32 %v848_v26  ;;  %v4489_v31 = vadd.f32 %v3133_v27, %v4478_v10  ;;  %v4508_v57 = vadd.f32 %v3157_v45, %v4478_v10 }
 0x185   : > { %v3135_v33 = vpop.f32.mrf.mxu0  ;;  %v3159_v34 = vpop.f32.mrf.mxu1 }
 0x186   : > { %v850_v35 = vmul.f32 1.442695, %v4489_v31  ;;  %v3136_v36 = vadd.f32 %v3135_v33, %v3134_v29  ;;  %v3160_v49 = vadd.f32 %v3159_v34, %v3158_v30  ;;  %v866_v7 = vmul.f32 1.442695, %v4508_v57 }
 0x187   : > { %v3137_v38 = vpop.f32.mrf.mxu0  ;;  %v3161_v39 = vpop.f32.mrf.mxu1  ;;  %vm832_vm2 = vcmp.gt.f32.partialorder %v4489_v31, 0.0  ;;  %vm840_vm8 = vcmp.gt.f32.partialorder %v4508_v57, 0.0 }
 0x188   : > { %3565 = vpow2.f32 %v850_v35  ;;  %v4496_v40 = vadd.f32 %v3136_v36, %v4478_v10  ;;  %v4512_v61 = vadd.f32 %v3160_v49, %v4478_v10 }
 0x189   : > { %v3138_v42 = vpop.f32.mrf.mxu0  ;;  %v3162_v43 = vpop.f32.mrf.mxu1 }
 0x18a   : > { %v852_v44 = vmul.f32 1.442695, %v4496_v40  ;;  %v3139_v46 = vadd.f32 %v3138_v42, %v3137_v38  ;;  %v3163_v55 = vadd.f32 %v3162_v43, %v3161_v39  ;;  %v868_v11 = vmul.f32 1.442695, %v4512_v61 }
 0x18b   : > { %v3140_v48 = vpop.f32.mrf.mxu0  ;;  %v3164_v50 = vpop.f32.mrf.mxu1  ;;  %vm833_vm3 = vcmp.gt.f32.partialorder %v4496_v40, 0.0  ;;  %vm841_vm10 = vcmp.gt.f32.partialorder %v4512_v61, 0.0 }
 0x18c   : > { %3567 = vpow2.f32 %v852_v44  ;;  %v4504_v51 = vadd.f32 %v3139_v46, %v4478_v10  ;;  %v4518_v3 = vadd.f32 %v3163_v55, %v4478_v10 }
 0x18d   : > { %v3562_v52 = vpop.eup %3561  ;;  %v3141_v54 = vpop.f32.mrf.mxu0  ;;  %3569 = vpow2.f32 %v862_v47 }
 0x18e   : > { %v3165_v56 = vpop.f32.mrf.mxu1  ;;  %v854_v58 = vmul.f32 1.442695, %v4504_v51  ;;  %v3142_v59 = vadd.f32 %v3141_v54, %v3140_v48  ;;  %v2936_v60 = vadd.f32 -1.0, %v3562_v52  ;;  %v870_v20 = vmul.f32 1.442695, %v4518_v3 }
 0x18f   : > { %v3143_v62 = vpop.f32.mrf.mxu0  ;;  %v3166_v63 = vadd.f32 %v3165_v56, %v3164_v50  ;;  %vm834_vm4 = vcmp.gt.f32.partialorder %v4504_v51, 0.0  ;;  %vm842_vm12 = vcmp.gt.f32.partialorder %v4518_v3, 0.0 }
 0x190   : > { %v3167_v0 = vpop.f32.mrf.mxu1  ;;  %3571 = vpow2.f32 %v854_v58  ;;  %v4515_v1 = vadd.f32 %v3142_v59, %v4478_v10  ;;  %v894_v15 = vmul.f32 1.6732632, %v2936_v60 }
 0x191   : > { %v3564_v2 = vpop.eup %3563  ;;  %3573 = vpow2.f32 %v864_v53  ;;  %v3144_v4 = vpop.f32.mrf.mxu0  ;;  %v4524_v13 = vadd.f32 %v3166_v63, %v4478_v10 }
 0x192   : > { %v3168_v5 = vpop.f32.mrf.mxu1  ;;  %v2937_v6 = vadd.f32 -1.0, %v3564_v2  ;;  %v856_v8 = vmul.f32 1.442695, %v4515_v1  ;;  %v3145_v9 = vadd.f32 %v3144_v4, %v3143_v62  ;;  %v910_v30 = vsel %vm830_vm0, %v4481_v16, %v894_v15 }
 0x193   : > { %v3146_v12 = vpop.f32.mrf.mxu0  ;;  %v3169_v22 = vadd.f32 %v3168_v5, %v3167_v0  ;;  %v872_v28 = vmul.f32 1.442695, %v4524_v13  ;;  %v926_v43 = vmul.f32 1.050701, %v910_v30  ;;  %vm835_vm5 = vcmp.gt.f32.partialorder %v4515_v1, 0.0 }
 0x194   : > { %v3170_v14 = vpop.f32.mrf.mxu1  ;;  %3575 = vpow2.f32 %v856_v8  ;;  %v4527_v17 = vadd.f32 %v3145_v9, %v4478_v10  ;;  %v895_v18 = vmul.f32 1.6732632, %v2937_v6  ;;  %vm843_vm13 = vcmp.gt.f32.partialorder %v4524_v13, 0.0 }
 0x195   : > { %v3566_v19 = vpop.eup %3565  ;;  %v3147_v21 = vpop.f32.mrf.mxu0  ;;  %3577 = vpow2.f32 %v866_v7  ;;  %v4542_v36 = vadd.f32 %v3169_v22, %v4478_v10 }
 0x196   : > { %v3171_v24 = vpop.f32.mrf.mxu1  ;;  %v2938_v25 = vadd.f32 -1.0, %v3566_v19  ;;  %v858_v26 = vmul.f32 1.442695, %v4527_v17  ;;  %v3148_v27 = vadd.f32 %v3147_v21, %v3146_v12  ;;  %3579 = vpow2.f32 %v868_v11 }
 0x197   : > { %v3172_v29 = vadd.f32 %v3171_v24, %v3170_v14  ;;  %v911_v34 = vsel %vm831_vm1, %v4485_v23, %v895_v18  ;;  %v874_v48 = vmul.f32 1.442695, %v4542_v36  ;;  %vm836_vm9 = vcmp.gt.f32.partialorder %v4527_v17, 0.0 }
 0x198   : > { %v896_v32 = vmul.f32 1.6732632, %v2938_v25  ;;  %3581 = vpow2.f32 %v858_v26  ;;  %v4536_v33 = vadd.f32 %v3148_v27, %v4478_v10  ;;  %v927_v38 = vmul.f32 1.050701, %v911_v34 }
 0x199   : > { %v3568_v35 = vpop.eup %3567  ;;  %3583 = vpow2.f32 %v870_v20  ;;  %v4546_v16 = vadd.f32 %v3172_v29, %v4478_v10  ;;  %vm844_vm14 = vcmp.gt.f32.partialorder %v4542_v36, 0.0 }
 0x19a   : > { %v2939_v39 = vadd.f32 -1.0, %v3568_v35  ;;  %v860_v42 = vmul.f32 1.442695, %v4536_v33  ;;  %3585 = vpow2.f32 %v872_v28  ;;  %v3570_v44 = vpop.eup %3569  ;;  %v912_v45 = vsel %vm832_vm2, %v4489_v31, %v896_v32 }
 0x19b   : > { %v942_v46 = vpack.c.bf16 %v927_v38, %v926_v43  ;;  %v876_v52 = vmul.f32 1.442695, %v4546_v16  ;;  %v928_v53 = vmul.f32 1.050701, %v912_v45  ;;  %v2944_v31 = vadd.f32 -1.0, %v3570_v44 }
 0x19c   : > { %v897_v23 = vmul.f32 1.6732632, %v2939_v39  ;;  %3587 = vpow2.f32 %v860_v42  ;;  %vm837_vm11 = vcmp.gt.f32.partialorder %v4536_v33, 0.0  ;;  %vm845_vm15 = vcmp.gt.f32.partialorder %v4546_v16, 0.0 }
 0x19d   : > { %v3572_v47 = vpop.eup %3571  ;;  %3285 = vmatprep.mubr.bf16.mxu1 %v942_v46  ;;  %3589 = vpow2.f32 %v874_v48  ;;  %v902_v4 = vmul.f32 1.6732632, %v2944_v31  ;;  %v3489_v31 = vld [vmem:[#allocation8 + $0x70] ss:$8 sps:$4 sm:$0xff]  }
 0x19e   : > { %v3574_v49 = vpop.eup %3573  ;;  %v913_v50 = vsel %vm833_vm3, %v4496_v40, %v897_v23  ;;  %v2940_v10 = vadd.f32 -1.0, %v3572_v47  ;;  %3591 = vpow2.f32 %v876_v52 }
 0x19f   : > { %v929_v54 = vmul.f32 1.050701, %v913_v50  ;;  %v2945_v59 = vadd.f32 -1.0, %v3574_v49  ;;  %v918_v19 = vsel %vm838_vm6, %v4493_v37, %v902_v4  ;;  %v3509_v4 = vld [vmem:[#allocation8 + $0x14] ss:$8 sps:$4 sm:$0xff]  }
 0x1a0   : > { %v898_v55 = vmul.f32 1.6732632, %v2940_v10  ;;  %v934_v27 = vmul.f32 1.050701, %v918_v19 }
 0x1a1   : > { %v3576_v56 = vpop.eup %3575  ;;  %v943_v58 = vpack.c.bf16 %v929_v54, %v928_v53  ;;  %v903_v8 = vmul.f32 1.6732632, %v2945_v59  ;;  %v3492_v59 = vld [vmem:[#allocation8 + $0x60] ss:$8 sps:$4 sm:$0xff]  }
 0x1a2   : > { %v2941_v60 = vadd.f32 -1.0, %v3576_v56  ;;  %v3578_v62 = vpop.eup %3577  ;;  %v914_v0 = vsel %vm834_vm4, %v4504_v51, %v898_v55  ;;  %v3491_v56 = vld [vmem:[#allocation8 + $0x74] ss:$8 sps:$4 sm:$0xff]  }
 0x1a3   : > { %3286 = vmatmul.mubr.bf16.vlgmr.msra.gmra.mxu1 %v943_v58  ;;  %v3580_v63 = vpop.eup %3579  ;;  %v930_v9 = vmul.f32 1.050701, %v914_v0  ;;  %v2946_v18 = vadd.f32 -1.0, %v3578_v62  ;;  %v919_v24 = vsel %vm839_vm7, %v4499_v41, %v903_v8  ;;  %1346 = vmatprep.subr.bf16.mxu1 %v3491_v56  ;;  %v3494_v58 = vld [vmem:[#allocation8 + $0x64] ss:$8 sps:$4 sm:$0xff]   ;;  %v4156_v8 = vmov 0  }
 0x1a4   : > { %v899_v40 = vmul.f32 1.6732632, %v2941_v60  ;;  %v2947_v20 = vadd.f32 -1.0, %v3580_v63  ;;  %v935_v37 = vmul.f32 1.050701, %v919_v24  ;;  %1347 = vmatpush1.bf16.msra.mxu1 %v3489_v31 }
 0x1a5   : > { %v3582_v2 = vpop.eup %3581  ;;  %v904_v28 = vmul.f32 1.6732632, %v2946_v18  ;;  %1348 = vmatprep.subr.bf16.mxu1 %v3494_v58  ;;  %v3497_v60 = vld [vmem:[#allocation8 + $0x54] ss:$8 sps:$4 sm:$0xff]   ;;  %v3495_v62 = vld [vmem:[#allocation8 + $0x50] ss:$8 sps:$4 sm:$0xff]  }
 0x1a6   : > { %v3584_v5 = vpop.eup %3583  ;;  %v2942_v6 = vadd.f32 -1.0, %v3582_v2  ;;  %v915_v7 = vsel %vm835_vm5, %v4515_v1, %v899_v40  ;;  %v905_v30 = vmul.f32 1.6732632, %v2947_v20  ;;  %v946_v43 = vpack.c.bf16 %v935_v37, %v934_v27  ;;  %v3503_v63 = vld [vmem:[#allocation8 + $0x34] ss:$8 sps:$4 sm:$0xff]  }
 0x1a7   : > { %v931_v11 = vmul.f32 1.050701, %v915_v7  ;;  %v3586_v12 = vpop.eup %3585  ;;  %v2948_v21 = vadd.f32 -1.0, %v3584_v5  ;;  %v3501_v40 = vld [vmem:[#allocation8 + $0x30] ss:$8 sps:$4 sm:$0xff]  }
 0x1a8   : > { %v900_v14 = vmul.f32 1.6732632, %v2942_v6  ;;  %v2949_v1 = vadd.f32 -1.0, %v3586_v12  ;;  %1349 = vmatpush1.bf16.msra.mxu1 %v3492_v59  ;;  %v3506_v0 = vld [vmem:[#allocation8 + $0x24] ss:$8 sps:$4 sm:$0xff]  }
 0x1a9   : > { %v3588_v15 = vpop.eup %3587  ;;  %v944_v51 = vpack.c.bf16 %v931_v11, %v930_v9  ;;  %v906_v32 = vmul.f32 1.6732632, %v2948_v21  ;;  %1350 = vmatprep.subr.bf16.mxu1 %v3497_v60  ;;  %v3504_v2 = vld [vmem:[#allocation8 + $0x20] ss:$8 sps:$4 sm:$0xff]   ;;  %v3507_v5 = vld [vmem:[#allocation8 + $0x10] ss:$8 sps:$4 sm:$0xff]  }
 0x1aa   : > { %v2943_v22 = vadd.f32 -1.0, %v3588_v15  ;;  %v916_v26 = vsel %vm836_vm9, %v4527_v17, %v900_v14  ;;  %v3590_v29 = vpop.eup %3589  ;;  %v907_v39 = vmul.f32 1.6732632, %v2949_v1  ;;  %v920_v17 = vsel %vm840_vm8, %v4508_v57, %v904_v28  ;;  %v3512_v6 = vld [vmem:[#allocation8 + $0x4] ss:$8 sps:$4 sm:$0xff]  }
 0x1ab   : > { %3289 = vmatprep.mubr.bf16.mxu1 %v944_v51  ;;  %v3592_v34 = vpop.eup %3591  ;;  %v932_v35 = vmul.f32 1.050701, %v916_v26  ;;  %v2950_v44 = vadd.f32 -1.0, %v3590_v29  ;;  %v922_v23 = vsel %vm842_vm12, %v4518_v3, %v906_v32  ;;  %v936_v47 = vmul.f32 1.050701, %v920_v17 }
 0x1ac   : > { %v901_v25 = vmul.f32 1.6732632, %v2943_v22  ;;  %v2951_v45 = vadd.f32 -1.0, %v3592_v34  ;;  %v923_v46 = vsel %vm843_vm13, %v4524_v13, %v907_v39  ;;  %v938_v49 = vmul.f32 1.050701, %v922_v23  ;;  %1351 = vmatpush1.bf16.msra.mxu1 %v3495_v62 }
 0x1ad   : > { %v939_v50 = vmul.f32 1.050701, %v923_v46  ;;  %v908_v10 = vmul.f32 1.6732632, %v2950_v44  ;;  %v3510_v7 = vld [vmem:[#allocation8] ss:$8 sps:$4 sm:$0xff]  }
 0x1ae   : > { %v917_v41 = vsel %vm837_vm11, %v4536_v33, %v901_v25  ;;  %v921_v33 = vsel %vm841_vm10, %v4512_v61, %v905_v30  ;;  %v909_v52 = vmul.f32 1.6732632, %v2951_v45  ;;  %v4586_v9 = vld [vmem:[%s5161_s8] ss:$0 sm:$0xff] }
 0x1af   : > { %v933_v38 = vmul.f32 1.050701, %v917_v41  ;;  %v937_v48 = vmul.f32 1.050701, %v921_v33  ;;  %v948_v53 = vpack.c.bf16 %v939_v50, %v938_v49  ;;  %v924_v61 = vsel %vm844_vm14, %v4542_v36, %v908_v10  ;;  %v3500_v36 = vld [vmem:[#allocation8 + $0x44] ss:$8 sps:$4 sm:$0xff]  }
 0x1b0   : > { %v925_v3 = vsel %vm845_vm15, %v4546_v16, %v909_v52  ;;  %v940_v13 = vmul.f32 1.050701, %v924_v61  ;;  %v3498_v16 = vld [vmem:[#allocation8 + $0x40] ss:$8 sps:$4 sm:$0xff]   ;;  %1352 = vmatprep.subr.bf16.mxu1 %v3500_v36 }
 0x1b1   : > { %v945_v42 = vpack.c.bf16 %v933_v38, %v932_v35  ;;  %v947_v57 = vpack.c.bf16 %v937_v48, %v936_v47  ;;  %v941_v54 = vmul.f32 1.050701, %v925_v3  ;;  %1353 = vmatpush1.bf16.msra.mxu1 %v3498_v16 }
 0x1b2   : > { %1354 = vmatprep.subr.bf16.mxu1 %v3503_v63 }
 0x1b3   : > { %3290 = vmatmul.mubr.bf16.gmra.mxu1 %v945_v42  ;;  %v949_v55 = vpack.c.bf16 %v941_v54, %v940_v13 }
 0x1b4   : > { %3293 = vmatprep.mubr.bf16.mxu1 %v946_v43 }
 0x1b5   : > { %1355 = vmatpush1.bf16.msra.mxu1 %v3501_v40 }
 0x1b6   : > { %1356 = vmatprep.subr.bf16.mxu1 %v3506_v0 }
 0x1b9   : > { %1357 = vmatpush1.bf16.msra.mxu1 %v3504_v2 }
 0x1ba   : > { %1358 = vmatprep.subr.bf16.mxu1 %v3509_v4 }
 0x1bb   : > { %3294 = vmatmul.mubr.bf16.gmra.mxu1 %v947_v57 }
 0x1bc   : > { %3297 = vmatprep.mubr.bf16.mxu1 %v948_v53 }
 0x1bd   : > { %1359 = vmatpush1.bf16.msra.mxu1 %v3507_v5 }
 0x1be   : > { %1360 = vmatprep.subr.bf16.mxu1 %v3512_v6 }
 0x1c1   : > { %1361 = vmatpush1.bf16.msra.mxu1 %v3510_v7 }
 0x1c3   : > { %3298 = vmatmul.mubr.bf16.gmra.mxu1 %v949_v55 }
 0x1c4   : > { %1378 = vmatprep.mubr.bf16.mxu1 %v4156_v8 }
 0x263   : > { %v3287_v11 = vpop.f32.mrf.mxu1 }
 0x264   : > { %v4589_v12 = vadd.f32 %v3287_v11, %v4586_v9 }
 0x265   : > { %v1055_v14 = vpop.f32.mrf.mxu1 }
 0x266   : > { %v1056_v15 = vadd.f32 %v4586_v9, %v1055_v14  ;;  %v1138_v20 = vmul.f32 1.442695, %v4589_v12  ;;  %vm1120_vm3 = vcmp.gt.f32.partialorder %v4589_v12, 0.0 }
 0x267   : > { %v3288_v18 = vpop.f32.mrf.mxu1 }
 0x268   : > { %v1134_v51 = vmul.f32 1.442695, %v1056_v15  ;;  %v1067_v19 = vadd.f32 %v3288_v18, %v4586_v9  ;;  %vm1118_vm0 = vcmp.gt.f32.partialorder %v1056_v15, 0.0 }
 0x269   : > { %v1058_v21 = vpop.f32.mrf.mxu1 }
 0x26a   : > { %3593 = vpow2.f32 %v1134_v51  ;;  %v1140_v22 = vmul.f32 1.442695, %v1067_v19  ;;  %v1059_v24 = vadd.f32 %v4586_v9, %v1058_v21  ;;  %vm1121_vm2 = vcmp.gt.f32.partialorder %v1067_v19, 0.0 }
 0x26c   : > { %3595 = vpow2.f32 %v1140_v22  ;;  %v1136_v1 = vmul.f32 1.442695, %v1059_v24  ;;  %vm1119_vm1 = vcmp.gt.f32.partialorder %v1059_v24, 0.0 }
 0x26d   : > { %3597 = vpow2.f32 %v1138_v20 }
 0x26e   : > { %3599 = vpow2.f32 %v1136_v1 }
 0x273   : > { %v3291_v25 = vpop.f32.mrf.mxu1 }
 0x274   : > { %v4599_v41 = vadd.f32 %v3291_v25, %v4586_v9 }
 0x275   : > { %v1071_v26 = vpop.f32.mrf.mxu1 }
 0x276   : > { %v4596_v27 = vadd.f32 %v4586_v9, %v1071_v26  ;;  %v1146_v23 = vmul.f32 1.442695, %v4599_v41  ;;  %vm1124_vm7 = vcmp.gt.f32.partialorder %v4599_v41, 0.0 }
 0x277   : > { %v3594_v37 = vpop.eup %3593  ;;  %v3292_v28 = vpop.f32.mrf.mxu1 }
 0x278   : > { %v2961_v29 = vadd.f32 -1.0, %v3594_v37  ;;  %v1142_v32 = vmul.f32 1.442695, %v4596_v27  ;;  %v4603_v34 = vadd.f32 %v3292_v28, %v4586_v9  ;;  %vm1122_vm4 = vcmp.gt.f32.partialorder %v4596_v27, 0.0 }
 0x279   : > { %v3596_v30 = vpop.eup %3595  ;;  %v1074_v35 = vpop.f32.mrf.mxu1 }
 0x27a   : > { %v3598_v38 = vpop.eup %3597  ;;  %v1182_v39 = vmul.f32 1.6732632, %v2961_v29  ;;  %v4606_v42 = vadd.f32 %v4586_v9, %v1074_v35  ;;  %3601 = vpow2.f32 %v1142_v32  ;;  %v1148_v17 = vmul.f32 1.442695, %v4603_v34 }
 0x27b   : > { %v3600_v43 = vpop.eup %3599  ;;  %v3295_v44 = vpop.f32.mrf.mxu1  ;;  %v2964_v45 = vadd.f32 -1.0, %v3596_v30  ;;  %v2963_v48 = vadd.f32 -1.0, %v3598_v38  ;;  %vm1125_vm6 = vcmp.gt.f32.partialorder %v4603_v34, 0.0 }
 0x27c   : > { %v2962_v33 = vadd.f32 -1.0, %v3600_v43  ;;  %v1144_v46 = vmul.f32 1.442695, %v4606_v42  ;;  %v1198_v49 = vsel %vm1118_vm0, %v1056_v15, %v1182_v39  ;;  %3603 = vpow2.f32 %v1148_v17 }
 0x27d   : > { %v1087_v47 = vpop.f32.mrf.mxu1  ;;  %v1185_v52 = vmul.f32 1.6732632, %v2964_v45  ;;  %v1214_v61 = vmul.f32 1.050701, %v1198_v49  ;;  %v1184_v54 = vmul.f32 1.6732632, %v2963_v48  ;;  %v4626_v2 = vadd.f32 %v3295_v44, %v4586_v9 }
 0x27e   : > { %v1183_v50 = vmul.f32 1.6732632, %v2962_v33  ;;  %3605 = vpow2.f32 %v1144_v46  ;;  %v4612_v53 = vadd.f32 %v4586_v9, %v1087_v47  ;;  %vm1123_vm5 = vcmp.gt.f32.partialorder %v4606_v42, 0.0 }
 0x27f   : > { %v3296_v10 = vpop.f32.mrf.mxu1  ;;  %3607 = vpow2.f32 %v1146_v23  ;;  %v1201_v58 = vsel %vm1121_vm2, %v1067_v19, %v1185_v52  ;;  %v1200_v36 = vsel %vm1120_vm3, %v4589_v12, %v1184_v54  ;;  %v1154_v18 = vmul.f32 1.442695, %v4626_v2 }
 0x280   : > { %v1199_v57 = vsel %vm1119_vm1, %v1059_v24, %v1183_v50  ;;  %v1150_v59 = vmul.f32 1.442695, %v4612_v53  ;;  %v4622_v16 = vadd.f32 %v3296_v10, %v4586_v9  ;;  %v1217_v63 = vmul.f32 1.050701, %v1201_v58 }
 0x281   : > { %v1215_v3 = vmul.f32 1.050701, %v1199_v57  ;;  %v1090_v13 = vpop.f32.mrf.mxu1  ;;  %v1216_v4 = vmul.f32 1.050701, %v1200_v36  ;;  %vm1126_vm9 = vcmp.gt.f32.partialorder %v4612_v53, 0.0  ;;  %vm1128_vm11 = vcmp.gt.f32.partialorder %v4626_v2, 0.0 }
 0x282   : > { %v4615_v55 = vadd.f32 %v4586_v9, %v1090_v13  ;;  %v1156_v6 = vmul.f32 1.442695, %v4622_v16  ;;  %vm1129_vm10 = vcmp.gt.f32.partialorder %v4622_v16, 0.0 }
 0x283   : > { %v1230_v56 = vpack.c.bf16 %v1215_v3, %v1214_v61  ;;  %v3299_v31 = vpop.f32.mrf.mxu1  ;;  %v1231_v12 = vpack.c.bf16 %v1217_v63, %v1216_v4 }
 0x284   : > { %v1152_v60 = vmul.f32 1.442695, %v4615_v55  ;;  %v1112_v33 = vadd.f32 %v3299_v31, %v4586_v9  ;;  %vm1127_vm8 = vcmp.gt.f32.partialorder %v4615_v55, 0.0 }
 0x285   : > { %v1103_v62 = vpop.f32.mrf.mxu1  ;;  %1379 = vmatmul.mubr.bf16.vlgmr.msra.gmra.mxu1 %v1230_v56 }
 0x286   : > { %3609 = vpow2.f32 %v1152_v60  ;;  %1388 = vmatprep.mubr.bf16.mxu1 %v4156_v8  ;;  %v4638_v25 = vadd.f32 %v4586_v9, %v1103_v62  ;;  %v1162_v50 = vmul.f32 1.442695, %v1112_v33  ;;  %vm1132_vm15 = vcmp.gt.f32.partialorder %v1112_v33, 0.0 }
 0x287   : > { %v3300_v40 = vpop.f32.mrf.mxu1  ;;  %v3602_v0 = vpop.eup %3601  ;;  %3611 = vpow2.f32 %v1150_v59 }
 0x288   : > { %v2965_v5 = vadd.f32 -1.0, %v3602_v0  ;;  %3613 = vpow2.f32 %v1156_v6  ;;  %v1158_v38 = vmul.f32 1.442695, %v4638_v25  ;;  %v4646_v44 = vadd.f32 %v3300_v40, %v4586_v9 }
 0x289   : > { %v3604_v7 = vpop.eup %3603  ;;  %v1106_v11 = vpop.f32.mrf.mxu1  ;;  %3615 = vpow2.f32 %v1154_v18  ;;  %vm1130_vm13 = vcmp.gt.f32.partialorder %v4638_v25, 0.0 }
 0x28a   : > { %v1186_v15 = vmul.f32 1.6732632, %v2965_v5  ;;  %v2968_v20 = vadd.f32 -1.0, %v3604_v7  ;;  %v4631_v21 = vadd.f32 %v4586_v9, %v1106_v11  ;;  %vm1133_vm14 = vcmp.gt.f32.partialorder %v4646_v44, 0.0 }
 0x28b   : > { %v3606_v14 = vpop.eup %3605 }
 0x28c   : > { %v3608_v51 = vpop.eup %3607  ;;  %v2966_v19 = vadd.f32 -1.0, %v3606_v14  ;;  %v1202_v1 = vsel %vm1122_vm4, %v4596_v27, %v1186_v15  ;;  %v1189_v37 = vmul.f32 1.6732632, %v2968_v20  ;;  %v1160_v29 = vmul.f32 1.442695, %v4631_v21 }
 0x28d   : > { %1389 = vmatmul.mubr.bf16.gmra.mxu1 %v1231_v12  ;;  %v2967_v24 = vadd.f32 -1.0, %v3608_v51  ;;  %v1218_v32 = vmul.f32 1.050701, %v1202_v1  ;;  %vm1131_vm12 = vcmp.gt.f32.partialorder %v4631_v21, 0.0  ;;  %v3513_v1 = vld [vmem:[#allocation13 + $0x78] sm:$0xff]  }
 0x28e   : > { %1398 = vmatprep.mubr.bf16.mxu1 %v4156_v8  ;;  %v1187_v22 = vmul.f32 1.6732632, %v2966_v19  ;;  %v1205_v27 = vsel %vm1125_vm6, %v4603_v34, %v1189_v37  ;;  %3617 = vpow2.f32 %v1160_v29  ;;  %v1164_v34 = vmul.f32 1.442695, %v4646_v44  ;;  %3189 = vmatprep.subr.bf16.mxu0 %v3513_v1  ;;  %v3516_v37 = vld [vmem:[#allocation13 + $0x30] sm:$0xff]   ;;  %v3518_v29 = vld [vmem:[#allocation13 + $0x28] sm:$0xff]  }
 0x28f   : > { %v1188_v35 = vmul.f32 1.6732632, %v2967_v24  ;;  %3619 = vpow2.f32 %v1158_v38  ;;  %v1221_v23 = vmul.f32 1.050701, %v1205_v27  ;;  %v3522_v38 = vld [vmem:[#allocation13 + $0x18] sm:$0xff]   ;;  %v3525_v27 = vld [vmem:[#allocation13 + $0x48] sm:$0xff]  }
 0x290   : > { %v1203_v26 = vsel %vm1123_vm5, %v4606_v42, %v1187_v22  ;;  %3621 = vpow2.f32 %v1164_v34 }
 0x291   : > { %v1219_v28 = vmul.f32 1.050701, %v1203_v26  ;;  %v1204_v42 = vsel %vm1124_vm7, %v4599_v41, %v1188_v35  ;;  %3623 = vpow2.f32 %v1162_v50  ;;  %v3515_v26 = vld [vmem:[#allocation13 + $0x70] sm:$0xff]   ;;  %v3521_v35 = vld [vmem:[#allocation13 + $0x58] sm:$0xff]  }
 0x292   : > { %v1220_v48 = vmul.f32 1.050701, %v1204_v42  ;;  %v3528_v42 = vld [vmem:[#allocation13] sm:$0xff]  }
 0x293   : > { %v3610_v30 = vpop.eup %3609  ;;  %v1232_v43 = vpack.c.bf16 %v1219_v28, %v1218_v32  ;;  %v3517_v28 = vld [vmem:[#allocation13 + $0x68] sm:$0xff]   ;;  %v3520_v32 = vld [vmem:[#allocation13 + $0x20] sm:$0xff]  }
 0x294   : > { %v3612_v39 = vpop.eup %3611  ;;  %v2970_v17 = vadd.f32 -1.0, %v3610_v30  ;;  %v1233_v52 = vpack.c.bf16 %v1221_v23, %v1220_v48  ;;  %v3519_v30 = vld [vmem:[#allocation13 + $0x60] sm:$0xff]   ;;  %v3531_v23 = vld [vmem:[#allocation11 + $0x28] sm:$0xff]  }
 0x295   : > { %1399 = vmatmul.mubr.bf16.gmra.mxu1 %v1232_v43  ;;  %v2969_v45 = vadd.f32 -1.0, %v3612_v39  ;;  %v3614_v47 = vpop.eup %3613  ;;  %v3523_v39 = vld [vmem:[#allocation13 + $0x50] sm:$0xff]   ;;  %v1254_v48 = vld [vmem:[%s5162_s9] sm:$0x3] }
 0x296   : > { %1408 = vmatprep.mubr.bf16.mxu1 %v4156_v8  ;;  %v1191_v46 = vmul.f32 1.6732632, %v2970_v17  ;;  %v3616_v10 = vpop.eup %3615  ;;  %v2972_v57 = vadd.f32 -1.0, %v3614_v47  ;;  %v3524_v43 = vld [vmem:[#allocation13 + $0x10] sm:$0xff]   ;;  %v3526_v17 = vld [vmem:[#allocation13 + $0x8] sm:$0xff]  }
 0x297   : > { %v1190_v49 = vmul.f32 1.6732632, %v2969_v45  ;;  %v2971_v9 = vadd.f32 -1.0, %v3616_v10  ;;  %v3529_v45 = vld [vmem:[#allocation11 + $0x38] sm:$0xff]  }
 0x298   : > { %v1207_v41 = vsel %vm1127_vm8, %v4615_v55, %v1191_v46  ;;  %v1193_v13 = vmul.f32 1.6732632, %v2972_v57  ;;  %3301 = vmatprep.subr.bf16.mxu1 %v3529_v45  ;;  %v1256_v46 = vlaneseq }
 0x299   : > { %v1206_v61 = vsel %vm1126_vm9, %v4612_v53, %v1190_v49  ;;  %v1223_v3 = vmul.f32 1.050701, %v1207_v41  ;;  %v1192_v31 = vmul.f32 1.6732632, %v2971_v9  ;;  %3302 = vmatpush3.bf16.msra.mxu1 %v3529_v45 }
 0x29a   : > { %v1222_v56 = vmul.f32 1.050701, %v1206_v61  ;;  %v1209_v55 = vsel %vm1129_vm10, %v4622_v16, %v1193_v13  ;;  %v4671_v34 = vshrl.u32 %v1256_v46, 7 }
 0x29b   : > { %v3618_v54 = vpop.eup %3617  ;;  %v1208_v53 = vsel %vm1128_vm11, %v4626_v2, %v1192_v31  ;;  %v1225_v36 = vmul.f32 1.050701, %v1209_v55 }
 0x29c   : > { %v3620_v58 = vpop.eup %3619  ;;  %v1234_v59 = vpack.c.bf16 %v1223_v3, %v1222_v56  ;;  %v2974_v60 = vadd.f32 -1.0, %v3618_v54  ;;  %v1224_v0 = vmul.f32 1.050701, %v1208_v53  ;;  %v1258_v47 = vsub.s32 0, %v4671_v34 }
 0x29d   : > { %1409 = vmatmul.mubr.bf16.gmra.mxu1 %v1233_v52  ;;  %v2973_v62 = vadd.f32 -1.0, %v3620_v58  ;;  %v3622_v40 = vpop.eup %3621  ;;  %v1262_v49 = vsub.s32 1, %v4671_v34 }
 0x29e   : > { %1418 = vmatprep.mubr.bf16.mxu1 %v4156_v8  ;;  %v1195_v63 = vmul.f32 1.6732632, %v2974_v60  ;;  %v3624_v5 = vpop.eup %3623  ;;  %v1235_v6 = vpack.c.bf16 %v1225_v36, %v1224_v0  ;;  %v2976_v7 = vadd.f32 -1.0, %v3622_v40  ;;  %v4680_v50 = vrot.slane %v1254_v48, %v1258_v47 }
 0x29f   : > { %v1194_v4 = vmul.f32 1.6732632, %v2973_v62  ;;  %v2975_v11 = vadd.f32 -1.0, %v3624_v5  ;;  %v4684_v10 = vrot.slane %v1254_v48, %v1262_v49 }
 0x2a0   : > { %v1211_v16 = vsel %vm1131_vm12, %v4631_v21, %v1195_v63  ;;  %v1197_v14 = vmul.f32 1.6732632, %v2976_v7 }
 0x2a1   : > { %v1210_v2 = vsel %vm1130_vm13, %v4638_v25, %v1194_v4  ;;  %v1227_v12 = vmul.f32 1.050701, %v1211_v16  ;;  %v1196_v18 = vmul.f32 1.6732632, %v2975_v11  ;;  %v3514_v25 = vld [vmem:[#allocation13 + $0x38] sm:$0xff]  }
 0x2a2   : > { %v1226_v15 = vmul.f32 1.050701, %v1210_v2  ;;  %v1213_v19 = vsel %vm1133_vm14, %v4646_v44, %v1197_v14  ;;  %3190 = vmatpush3.bf16.msra.mxu0 %v3514_v25  ;;  %v3527_v44 = vld [vmem:[#allocation13 + $0x40] sm:$0xff]  }
 0x2a3   : > { %v1212_v20 = vsel %vm1132_vm15, %v1112_v33, %v1196_v18  ;;  %v1229_v21 = vmul.f32 1.050701, %v1213_v19  ;;  %3191 = vmatprep.subr.bf16.mxu0 %v3515_v26  ;;  %v3530_v33 = vld [vmem:[#allocation11 + $0x30] sm:$0xff]  }
 0x2a4   : > { %v1236_v51 = vpack.c.bf16 %v1227_v12, %v1226_v15  ;;  %v1228_v22 = vmul.f32 1.050701, %v1212_v20  ;;  %3303 = vmatprep.subr.bf16.mxu1 %v3530_v33 }
 0x2a5   : > { %1419 = vmatmul.mubr.bf16.gmra.mxu1 %v1234_v59 }
 0x2a6   : > { %1428 = vmatprep.mubr.bf16.mxu1 %v4156_v8  ;;  %v1237_v24 = vpack.c.bf16 %v1229_v21, %v1228_v22  ;;  %3192 = vmatpush3.bf16.msra.mxu0 %v3516_v37 }
 0x2a7   : > { %3193 = vmatprep.subr.bf16.mxu0 %v3517_v28  ;;  %3304 = vmatpush3.bf16.msra.mxu1 %v3530_v33 }
 0x2a8   : > { %3305 = vmatprep.subr.bf16.mxu1 %v3531_v23 }
 0x2aa   : > { %3194 = vmatpush3.bf16.msra.mxu0 %v3518_v29 }
 0x2ab   : > { %3195 = vmatprep.subr.bf16.mxu0 %v3519_v30  ;;  %3306 = vmatpush3.bf16.msra.mxu1 %v3531_v23 }
 0x2ad   : > { %1429 = vmatmul.mubr.bf16.gmra.mxu1 %v1235_v6 }
 0x2ae   : > { %1438 = vmatprep.mubr.bf16.mxu1 %v4156_v8  ;;  %3196 = vmatpush3.bf16.msra.mxu0 %v3520_v32 }
 0x2af   : > { %3197 = vmatprep.subr.bf16.mxu0 %v3521_v35 }
 0x2b2   : > { %3198 = vmatpush3.bf16.msra.mxu0 %v3522_v38 }
 0x2b3   : > { %3199 = vmatprep.subr.bf16.mxu0 %v3523_v39 }
 0x2b5   : > { %1439 = vmatmul.mubr.bf16.gmra.mxu1 %v1236_v51 }
 0x2b6   : > { %1448 = vmatprep.mubr.bf16.mxu1 %v4156_v8  ;;  %3200 = vmatpush3.bf16.msra.mxu0 %v3524_v43 }
 0x2b7   : > { %3201 = vmatprep.subr.bf16.mxu0 %v3525_v27 }
 0x2ba   : > { %3202 = vmatpush3.bf16.msra.mxu0 %v3526_v17 }
 0x2bb   : > { %3203 = vmatprep.subr.bf16.mxu0 %v3527_v44 }
 0x2bd   : > { %1449 = vmatmul.mubr.bf16.gmra.mxu1 %v1237_v24 }
 0x2be   : > { %3204 = vmatpush3.bf16.msra.mxu0 %v3528_v42 }
 0x345   : > { %v1380_v52 = vpop.f32.mrf.mxu1 }
 0x346   : > { %v4687_v57 = vadd.f32 %v1380_v52, %v4680_v50 }
 0x347   : > { %v1382_v41 = vpop.f32.mrf.mxu1 }
 0x348   : > { %v1491_v9 = vmul.f32 1.442695, %v4687_v57  ;;  %v4691_v61 = vadd.f32 %v1382_v41, %v4684_v10  ;;  %vm1459_vm0 = vcmp.gt.f32.partialorder %v4687_v57, 0.0 }
 0x349   : > { %v1384_v3 = vpop.f32.mrf.mxu1 }
 0x34a   : > { %3625 = vpow2.f32 %v1491_v9  ;;  %v1493_v13 = vmul.f32 1.442695, %v4691_v61  ;;  %v4695_v54 = vadd.f32 %v1384_v3, %v4680_v50  ;;  %vm1460_vm2 = vcmp.gt.f32.partialorder %v4691_v61, 0.0 }
 0x34b   : > { %v1386_v56 = vpop.f32.mrf.mxu1 }
 0x34c   : > { %3627 = vpow2.f32 %v1493_v13  ;;  %v1495_v31 = vmul.f32 1.442695, %v4695_v54  ;;  %v1387_v58 = vadd.f32 %v1386_v56, %v4684_v10  ;;  %vm1461_vm3 = vcmp.gt.f32.partialorder %v4695_v54, 0.0 }
 0x34d   : > { %v1390_v59 = vpop.f32.mrf.mxu1 }
 0x34e   : > { %3629 = vpow2.f32 %v1495_v31  ;;  %v1497_v55 = vmul.f32 1.442695, %v1387_v58  ;;  %v4700_v60 = vadd.f32 %v1390_v59, %v4680_v50  ;;  %vm1462_vm1 = vcmp.gt.f32.partialorder %v1387_v58, 0.0 }
 0x34f   : > { %v1392_v53 = vpop.f32.mrf.mxu1 }
 0x350   : > { %3631 = vpow2.f32 %v1497_v55  ;;  %v1499_v62 = vmul.f32 1.442695, %v4700_v60  ;;  %v4704_v36 = vadd.f32 %v1392_v53, %v4684_v10  ;;  %vm1463_vm6 = vcmp.gt.f32.partialorder %v4700_v60, 0.0 }
 0x351   : > { %v1394_v63 = vpop.f32.mrf.mxu1 }
 0x352   : > { %v1501_v40 = vmul.f32 1.442695, %v4704_v36  ;;  %v4708_v0 = vadd.f32 %v1394_v63, %v4680_v50  ;;  %3633 = vpow2.f32 %v1499_v62  ;;  %vm1464_vm7 = vcmp.gt.f32.partialorder %v4704_v36, 0.0 }
 0x353   : > { %v1396_v4 = vpop.f32.mrf.mxu1 }
 0x354   : > { %3635 = vpow2.f32 %v1501_v40  ;;  %v1503_v5 = vmul.f32 1.442695, %v4708_v0  ;;  %v4712_v6 = vadd.f32 %v1396_v4, %v4684_v10  ;;  %vm1465_vm5 = vcmp.gt.f32.partialorder %v4708_v0, 0.0 }
 0x355   : > { %v1400_v11 = vpop.f32.mrf.mxu1 }
 0x356   : > { %3637 = vpow2.f32 %v1503_v5  ;;  %v1505_v7 = vmul.f32 1.442695, %v4712_v6  ;;  %v4716_v2 = vadd.f32 %v1400_v11, %v4680_v50  ;;  %vm1466_vm4 = vcmp.gt.f32.partialorder %v4712_v6, 0.0 }
 0x357   : > { %v3626_v16 = vpop.eup %3625  ;;  %v1402_v14 = vpop.f32.mrf.mxu1 }
 0x358   : > { %3639 = vpow2.f32 %v1505_v7  ;;  %v2993_v15 = vadd.f32 -1.0, %v3626_v16  ;;  %v4719_v19 = vadd.f32 %v1402_v14, %v4684_v10  ;;  %v1507_v22 = vmul.f32 1.442695, %v4716_v2 }
 0x359   : > { %v3628_v12 = vpop.eup %3627  ;;  %v1404_v20 = vpop.f32.mrf.mxu1  ;;  %vm1467_vm8 = vcmp.gt.f32.partialorder %v4716_v2, 0.0 }
 0x35a   : > { %v2994_v51 = vadd.f32 -1.0, %v3628_v12  ;;  %v1509_v1 = vmul.f32 1.442695, %v4719_v19  ;;  %v4724_v25 = vadd.f32 %v1404_v20, %v4680_v50  ;;  %v1587_v37 = vmul.f32 1.6732632, %v2993_v15 }
 0x35b   : > { %v3630_v18 = vpop.eup %3629  ;;  %v1406_v26 = vpop.f32.mrf.mxu1  ;;  %vm1468_vm9 = vcmp.gt.f32.partialorder %v4719_v19, 0.0 }
 0x35c   : > { %v2995_v21 = vadd.f32 -1.0, %v3630_v18  ;;  %v4727_v29 = vadd.f32 %v1406_v26, %v4684_v10  ;;  %v1588_v30 = vmul.f32 1.6732632, %v2994_v51  ;;  %3641 = vpow2.f32 %v1509_v1 }
 0x35d   : > { %v3632_v24 = vpop.eup %3631  ;;  %v1511_v35 = vmul.f32 1.442695, %v4724_v25  ;;  %v1410_v38 = vpop.f32.mrf.mxu1  ;;  %3643 = vpow2.f32 %v1507_v22  ;;  %v1619_v46 = vsel %vm1459_vm0, %v4687_v57, %v1587_v37  ;;  %vm1469_vm11 = vcmp.gt.f32.partialorder %v4724_v25, 0.0 }
 0x35e   : > { %v2996_v28 = vadd.f32 -1.0, %v3632_v24  ;;  %v1589_v32 = vmul.f32 1.6732632, %v2995_v21  ;;  %v1513_v17 = vmul.f32 1.442695, %v4727_v29  ;;  %v4733_v44 = vadd.f32 %v1410_v38, %v4680_v50 }
 0x35f   : > { %v3634_v39 = vpop.eup %3633  ;;  %3645 = vpow2.f32 %v1511_v35  ;;  %v1412_v42 = vpop.f32.mrf.mxu1  ;;  %v1620_v48 = vsel %vm1460_vm2, %v4691_v61, %v1588_v30  ;;  %v1651_v57 = vmul.f32 1.050701, %v1619_v46  ;;  %vm1470_vm10 = vcmp.gt.f32.partialorder %v4727_v29, 0.0 }
 0x360   : > { %v1590_v43 = vmul.f32 1.6732632, %v2996_v28  ;;  %v4738_v33 = vadd.f32 %v1412_v42, %v4684_v10  ;;  %v1621_v52 = vsel %vm1461_vm3, %v4695_v54, %v1589_v32  ;;  %3647 = vpow2.f32 %v1513_v17 }
 0x361   : > { %v3636_v27 = vpop.eup %3635  ;;  %v1414_v41 = vpop.f32.mrf.mxu1  ;;  %v2997_v9 = vadd.f32 -1.0, %v3634_v39  ;;  %v1515_v56 = vmul.f32 1.442695, %v4733_v44  ;;  %v1653_v62 = vmul.f32 1.050701, %v1621_v52  ;;  %vm1471_vm12 = vcmp.gt.f32.partialorder %v4733_v44, 0.0 }
 0x362   : > { %v1622_v45 = vsel %vm1462_vm1, %v1387_v58, %v1590_v43  ;;  %v2998_v3 = vadd.f32 -1.0, %v3636_v27  ;;  %v1517_v58 = vmul.f32 1.442695, %v4738_v33  ;;  %v4746_v55 = vadd.f32 %v1414_v41, %v4680_v50 }
 0x363   : > { %v3638_v23 = vpop.eup %3637  ;;  %v1654_v59 = vmul.f32 1.050701, %v1622_v45  ;;  %v1416_v53 = vpop.f32.mrf.mxu1  ;;  %3649 = vpow2.f32 %v1515_v56  ;;  %v1652_v54 = vmul.f32 1.050701, %v1620_v48  ;;  %v1591_v5 = vmul.f32 1.6732632, %v2997_v9 }
 0x364   : > { %v2999_v13 = vadd.f32 -1.0, %v3638_v23  ;;  %3651 = vpow2.f32 %v1517_v58  ;;  %v1519_v40 = vmul.f32 1.442695, %v4746_v55  ;;  %v1592_v7 = vmul.f32 1.6732632, %v2998_v3 }
 0x365   : > { %v3640_v31 = vpop.eup %3639  ;;  %v1420_v4 = vpop.f32.mrf.mxu1  ;;  %v4750_v11 = vadd.f32 %v1416_v53, %v4684_v10  ;;  %v1684_v15 = vpack.c.bf16 %v1654_v59, %v1652_v54  ;;  %v1683_v18 = vpack.c.bf16 %v1653_v62, %v1651_v57  ;;  %v1623_v26 = vsel %vm1463_vm6, %v4700_v60, %v1591_v5 }
 0x366   : > { %v3000_v61 = vadd.f32 -1.0, %v3640_v31  ;;  %v1593_v63 = vmul.f32 1.6732632, %v2999_v13  ;;  %3653 = vpow2.f32 %v1519_v40  ;;  %v4754_v12 = vadd.f32 %v1420_v4, %v4680_v50 }
 0x367   : > { %v1422_v14 = vpop.f32.mrf.mxu1  ;;  %v1521_v20 = vmul.f32 1.442695, %v4750_v11  ;;  %1866 = vmatprep.mubr.bf16.mxu0 %v1684_v15  ;;  %v1624_v37 = vsel %vm1464_vm7, %v4704_v36, %v1592_v7  ;;  %v1655_v36 = vmul.f32 1.050701, %v1623_v26  ;;  %vm1472_vm13 = vcmp.gt.f32.partialorder %v4738_v33, 0.0 }
 0x368   : > { %v1594_v16 = vmul.f32 1.6732632, %v3000_v61  ;;  %v1625_v21 = vsel %vm1465_vm5, %v4708_v0, %v1593_v63  ;;  %v4763_v22 = vadd.f32 %v1422_v14, %v4684_v10  ;;  %1867 = vmatmul.mubr.bf16.vlgmr.msra.gmra.mxu0 %v1683_v18  ;;  %v1523_v32 = vmul.f32 1.442695, %v4754_v12 }
 0x369   : > { %v1424_v24 = vpop.f32.mrf.mxu1  ;;  %v3642_v1 = vpop.eup %3641  ;;  %3655 = vpow2.f32 %v1521_v20  ;;  %v1657_v39 = vmul.f32 1.050701, %v1625_v21  ;;  %v1656_v17 = vmul.f32 1.050701, %v1624_v37  ;;  %vm1473_vm14 = vcmp.gt.f32.partialorder %v4746_v55, 0.0 }
 0x36a   : > { %v1626_v51 = vsel %vm1466_vm4, %v4712_v6, %v1594_v16  ;;  %v4768_v6 = vadd.f32 %v1424_v24, %v4680_v50  ;;  %v3644_v28 = vpop.eup %3643  ;;  %v1525_v0 = vmul.f32 1.442695, %v4763_v22  ;;  %v3002_v43 = vadd.f32 -1.0, %v3642_v1 }
 0x36b   : > { %v1658_v30 = vmul.f32 1.050701, %v1626_v51  ;;  %v1426_v35 = vpop.f32.mrf.mxu1  ;;  %v3001_v46 = vadd.f32 -1.0, %v3644_v28  ;;  %v1685_v31 = vpack.c.bf16 %v1657_v39, %v1655_v36  ;;  %vm1474_vm15 = vcmp.gt.f32.partialorder %v4750_v11, 0.0 }
 0x36c   : > { %v3646_v38 = vpop.eup %3645  ;;  %v1527_v27 = vmul.f32 1.442695, %v4768_v6  ;;  %v4774_v60 = vadd.f32 %v1426_v35, %v4684_v10  ;;  %3657 = vpow2.f32 %v1525_v0  ;;  %v1596_v13 = vmul.f32 1.6732632, %v3002_v43 }
 0x36d   : > { %v3003_v42 = vadd.f32 -1.0, %v3646_v38  ;;  %v1430_v45 = vpop.f32.mrf.mxu1  ;;  %v3648_v23 = vpop.eup %3647  ;;  %v1686_v3 = vpack.c.bf16 %v1658_v30, %v1656_v17  ;;  %v1595_v61 = vmul.f32 1.6732632, %v3001_v46  ;;  %vm1476_vm0 = vcmp.gt.f32.partialorder %v4763_v22, 0.0 }
 0x36e   : > { %3659 = vpow2.f32 %v1527_v27  ;;  %v1529_v48 = vmul.f32 1.442695, %v4774_v60  ;;  %v4778_v52 = vadd.f32 %v1430_v45, %v4680_v50  ;;  %v3004_v41 = vadd.f32 -1.0, %v3648_v23 }
 0x36f   : > { %3661 = vpow2.f32 %v1523_v32  ;;  %v1432_v9 = vpop.f32.mrf.mxu1  ;;  %v1597_v56 = vmul.f32 1.6732632, %v3003_v42  ;;  %1874 = vmatprep.mubr.bf16.mxu0 %v1686_v3  ;;  %v1628_v14 = vsel %vm1468_vm9, %v4719_v19, %v1596_v13  ;;  %v1627_v24 = vsel %vm1467_vm8, %v4716_v2, %v1595_v61 }
 0x370   : > { %3663 = vpow2.f32 %v1529_v48  ;;  %v3650_v59 = vpop.eup %3649  ;;  %v1598_v58 = vmul.f32 1.6732632, %v3004_v41  ;;  %v4783_v53 = vadd.f32 %v1432_v9, %v4684_v10  ;;  %v1531_v54 = vmul.f32 1.442695, %v4778_v52  ;;  %1875 = vmatmul.mubr.bf16.gmra.mxu0 %v1685_v31 }
 0x371   : > { %v1434_v57 = vpop.f32.mrf.mxu1  ;;  %v3652_v62 = vpop.eup %3651  ;;  %v3005_v4 = vadd.f32 -1.0, %v3650_v59  ;;  %v1629_v15 = vsel %vm1469_vm11, %v4724_v25, %v1597_v56  ;;  %v1660_v30 = vmul.f32 1.050701, %v1628_v14  ;;  %v1659_v35 = vmul.f32 1.050701, %v1627_v24 }
 0x372   : > { %v4788_v63 = vadd.f32 %v1434_v57, %v4680_v50  ;;  %v1630_v40 = vsel %vm1470_vm10, %v4727_v29, %v1598_v58  ;;  %v1533_v5 = vmul.f32 1.442695, %v4783_v53  ;;  %v3006_v51 = vadd.f32 -1.0, %v3652_v62 }
 0x373   : > { %v1436_v7 = vpop.f32.mrf.mxu1  ;;  %v3654_v16 = vpop.eup %3653  ;;  %v1662_v1 = vmul.f32 1.050701, %v1630_v40  ;;  %v1661_v26 = vmul.f32 1.050701, %v1629_v15  ;;  %v1599_v37 = vmul.f32 1.6732632, %v3005_v4 }
 0x374   : > { %v4799_v18 = vadd.f32 %v1436_v7, %v4684_v10  ;;  %v3007_v20 = vadd.f32 -1.0, %v3654_v16  ;;  %3665 = vpow2.f32 %v1533_v5  ;;  %v1535_v29 = vmul.f32 1.442695, %v4788_v63 }
 0x375   : > { %v1440_v21 = vpop.f32.mrf.mxu1  ;;  %3667 = vpow2.f32 %v1531_v54  ;;  %v1600_v38 = vmul.f32 1.6732632, %v3006_v51  ;;  %v1688_v17 = vpack.c.bf16 %v1662_v1, %v1660_v30  ;;  %v1631_v45 = vsel %vm1471_vm12, %v4733_v44, %v1599_v37 }
 0x376   : > { %v1537_v19 = vmul.f32 1.442695, %v4799_v18  ;;  %v3656_v25 = vpop.eup %3655  ;;  %3669 = vpow2.f32 %v1535_v29  ;;  %v4808_v0 = vadd.f32 %v1440_v21, %v4680_v50  ;;  %v1601_v2 = vmul.f32 1.6732632, %v3007_v20 }
 0x377   : > { %v1442_v28 = vpop.f32.mrf.mxu1  ;;  %v3008_v32 = vadd.f32 -1.0, %v3656_v25  ;;  %v1687_v46 = vpack.c.bf16 %v1661_v26, %v1659_v35  ;;  %1882 = vmatprep.mubr.bf16.mxu0 %v1688_v17  ;;  %v1632_v44 = vsel %vm1472_vm13, %v4738_v33, %v1600_v38  ;;  %vm1475_vm1 = vcmp.gt.f32.partialorder %v4754_v12, 0.0 }
 0x378   : > { %3671 = vpow2.f32 %v1537_v19  ;;  %v4811_v39 = vadd.f32 %v1442_v28, %v4684_v10  ;;  %v1539_v3 = vmul.f32 1.442695, %v4808_v0  ;;  %v1633_v59 = vsel %vm1473_vm14, %v4746_v55, %v1601_v2 }
 0x379   : > { %v1444_v43 = vpop.f32.mrf.mxu1  ;;  %v3658_v27 = vpop.eup %3657  ;;  %v1602_v36 = vmul.f32 1.6732632, %v3008_v32  ;;  %1883 = vmatmul.mubr.bf16.gmra.mxu0 %v1687_v46  ;;  %v1663_v40 = vmul.f32 1.050701, %v1631_v45  ;;  %vm1478_vm2 = vcmp.gt.f32.partialorder %v4774_v60, 0.0  ;;  %vm1477_vm3 = vcmp.gt.f32.partialorder %v4768_v6, 0.0 }
 0x37a   : > { %v3010_v23 = vadd.f32 -1.0, %v3658_v27  ;;  %v1541_v13 = vmul.f32 1.442695, %v4811_v39  ;;  %v4823_v56 = vadd.f32 %v1444_v43, %v4680_v50  ;;  %v1664_v55 = vmul.f32 1.050701, %v1632_v44 }
 0x37b   : > { %v3660_v42 = vpop.eup %3659  ;;  %v1446_v48 = vpop.f32.mrf.mxu1  ;;  %v1634_v9 = vsel %vm1474_vm15, %v4750_v11, %v1602_v36  ;;  %v1665_v7 = vmul.f32 1.050701, %v1633_v59  ;;  %vm1480_vm4 = vcmp.gt.f32.partialorder %v4783_v53, 0.0  ;;  %vm1482_vm5 = vcmp.gt.f32.partialorder %v4799_v18, 0.0 }
 0x37c   : > { %v3662_v41 = vpop.eup %3661  ;;  %v3011_v58 = vadd.f32 -1.0, %v3660_v42  ;;  %v4832_v11 = vadd.f32 %v1446_v48, %v4684_v10  ;;  %v1666_v62 = vmul.f32 1.050701, %v1634_v9  ;;  %v1604_v61 = vmul.f32 1.6732632, %v3010_v23 }
 0x37d   : > { %v3664_v31 = vpop.eup %3663  ;;  %v1450_v57 = vpop.f32.mrf.mxu1  ;;  %3673 = vpow2.f32 %v1541_v13  ;;  %v3009_v4 = vadd.f32 -1.0, %v3662_v41  ;;  %v1543_v33 = vmul.f32 1.442695, %v4823_v56  ;;  %v1689_v27 = vpack.c.bf16 %v1665_v7, %v1663_v40 }
 0x37e   : > { %v3012_v54 = vadd.f32 -1.0, %v3664_v31  ;;  %3675 = vpow2.f32 %v1539_v3  ;;  %v1605_v14 = vmul.f32 1.6732632, %v3011_v58  ;;  %v1545_v15 = vmul.f32 1.442695, %v4832_v11 }
 0x37f   : > { %v1452_v5 = vpop.f32.mrf.mxu1  ;;  %3677 = vpow2.f32 %v1543_v33  ;;  %v4839_v51 = vadd.f32 %v1450_v57, %v4680_v50  ;;  %v1636_v21 = vsel %vm1476_vm0, %v4763_v22, %v1604_v61  ;;  %v1690_v19 = vpack.c.bf16 %v1666_v62, %v1664_v55 }
 0x380   : > { %v1606_v16 = vmul.f32 1.6732632, %v3012_v54  ;;  %v4846_v1 = vadd.f32 %v1452_v5, %v4684_v10  ;;  %v1603_v26 = vmul.f32 1.6732632, %v3009_v4  ;;  %3679 = vpow2.f32 %v1545_v15 }
 0x381   : > { %v1454_v20 = vpop.f32.mrf.mxu1  ;;  %v3666_v29 = vpop.eup %3665  ;;  %v1547_v35 = vmul.f32 1.442695, %v4839_v51  ;;  %1890 = vmatprep.mubr.bf16.mxu0 %v1690_v19  ;;  %v1668_v38 = vmul.f32 1.050701, %v1636_v21  ;;  %v1637_v2 = vsel %vm1477_vm3, %v4768_v6, %v1605_v14  ;;  %vm1481_vm6 = vcmp.gt.f32.partialorder %v4788_v63, 0.0 }
 0x382   : > { %v1638_v24 = vsel %vm1478_vm2, %v4774_v60, %v1606_v16  ;;  %v3668_v25 = vpop.eup %3667  ;;  %v3014_v28 = vadd.f32 -1.0, %v3666_v29  ;;  %v1549_v22 = vmul.f32 1.442695, %v4846_v1  ;;  %v4854_v42 = vadd.f32 %v1454_v20, %v4680_v50  ;;  %1891 = vmatmul.mubr.bf16.gmra.mxu0 %v1689_v27 }
 0x383   : > { %v1670_v37 = vmul.f32 1.050701, %v1638_v24  ;;  %v1456_v30 = vpop.f32.mrf.mxu1  ;;  %v3670_v32 = vpop.eup %3669  ;;  %v1635_v23 = vsel %vm1475_vm1, %v4754_v12, %v1603_v26  ;;  %v3013_v6 = vadd.f32 -1.0, %v3668_v25  ;;  %v1669_v50 = vmul.f32 1.050701, %v1637_v2 }
 0x384   : > { %v1608_v43 = vmul.f32 1.6732632, %v3014_v28  ;;  %v3015_v36 = vadd.f32 -1.0, %v3670_v32  ;;  %v4857_v45 = vadd.f32 %v1456_v30, %v4684_v10  ;;  %3681 = vpow2.f32 %v1549_v22 }
 0x385   : > { %v3672_v60 = vpop.eup %3671  ;;  %v1692_v46 = vpack.c.bf16 %v1670_v37, %v1668_v38  ;;  %3683 = vpow2.f32 %v1547_v35  ;;  %v1551_v10 = vmul.f32 1.442695, %v4854_v42  ;;  %v1667_v31 = vmul.f32 1.050701, %v1635_v23 }
 0x386   : > { %v3016_v17 = vadd.f32 -1.0, %v3672_v60  ;;  %v1640_v48 = vsel %vm1480_vm4, %v4783_v53, %v1608_v43  ;;  %v1553_v9 = vmul.f32 1.442695, %v4857_v45  ;;  %v1609_v3 = vmul.f32 1.6732632, %v3015_v36 }
 0x387   : > { %1898 = vmatprep.mubr.bf16.mxu0 %v1692_v46  ;;  %v1672_v44 = vmul.f32 1.050701, %v1640_v48  ;;  %3685 = vpow2.f32 %v1551_v10  ;;  %v1607_v58 = vmul.f32 1.6732632, %v3013_v6  ;;  %v1691_v62 = vpack.c.bf16 %v1669_v50, %v1667_v31  ;;  %v3539_v31 = vld [vmem:[#allocation10 + $0x74] ss:$8 sps:$4 sm:$0xff]  }
 0x388   : > { %v1610_v41 = vmul.f32 1.6732632, %v3016_v17  ;;  %3687 = vpow2.f32 %v1553_v9  ;;  %v1641_v40 = vsel %vm1481_vm6, %v4788_v63, %v1609_v3  ;;  %vm1479_vm7 = vcmp.gt.f32.partialorder %v4778_v52, 0.0  ;;  %v3532_v3 = vld [vmem:[#allocation11 + $0x20] sm:$0xff]   ;;  %2447 = vmatprep.subr.bf16.mxu0 %v3539_v31 }
 0x389   : > { %v1639_v5 = vsel %vm1479_vm7, %v4778_v52, %v1607_v58  ;;  %v1673_v7 = vmul.f32 1.050701, %v1641_v40  ;;  %vm1484_vm8 = vcmp.gt.f32.partialorder %v4811_v39, 0.0  ;;  %vm1486_vm9 = vcmp.gt.f32.partialorder %v4832_v11, 0.0  ;;  %3307 = vmatprep.subr.bf16.mxu1 %v3532_v3  ;;  %v3545_v58 = vld [vmem:[#allocation10 + $0x54] ss:$8 sps:$4 sm:$0xff]  }
 0x38a   : > { %v1642_v12 = vsel %vm1482_vm5, %v4799_v18, %v1610_v41  ;;  %v3674_v13 = vpop.eup %3673  ;;  %1899 = vmatmul.mubr.bf16.gmra.mxu0 %v1691_v62  ;;  %v1671_v15 = vmul.f32 1.050701, %v1639_v5  ;;  %vm1485_vm10 = vcmp.gt.f32.partialorder %v4823_v56, 0.0  ;;  %vm1483_vm11 = vcmp.gt.f32.partialorder %v4808_v0, 0.0  ;;  %3308 = vmatpush3.bf16.msra.mxu1 %v3532_v3  ;;  %v3546_v62 = vld [vmem:[#allocation10 + $0x40] ss:$8 sps:$4 sm:$0xff]  }
 0x38b   : > { %v1674_v59 = vmul.f32 1.050701, %v1642_v12  ;;  %v3018_v57 = vadd.f32 -1.0, %v3674_v13  ;;  %v3676_v53 = vpop.eup %3675  ;;  %vm1488_vm12 = vcmp.gt.f32.partialorder %v4846_v1, 0.0  ;;  %vm1489_vm13 = vcmp.gt.f32.partialorder %v4854_v42, 0.0  ;;  %v3535_v12 = vld [vmem:[#allocation11 + $0x8] sm:$0xff]  }
 0x38c   : > { %v3678_v54 = vpop.eup %3677  ;;  %v3017_v55 = vadd.f32 -1.0, %v3676_v53  ;;  %v1693_v25 = vpack.c.bf16 %v1673_v7, %v1671_v15  ;;  %vm1490_vm14 = vcmp.gt.f32.partialorder %v4857_v45, 0.0  ;;  %vm1487_vm15 = vcmp.gt.f32.partialorder %v4839_v51, 0.0  ;;  %v3537_v13 = vld [vmem:[#allocation10 + $0x70] ss:$8 sps:$4 sm:$0xff]  }
 0x38d   : > { %v1694_v61 = vpack.c.bf16 %v1674_v59, %v1672_v44  ;;  %v1612_v4 = vmul.f32 1.6732632, %v3018_v57  ;;  %v3019_v18 = vadd.f32 -1.0, %v3678_v54  ;;  %v3680_v33 = vpop.eup %3679  ;;  %v3542_v44 = vld [vmem:[#allocation10 + $0x64] ss:$8 sps:$4 sm:$0xff]   ;;  %2448 = vmatpush1.bf16.msra.mxu0 %v3537_v13 }
 0x38e   : > { %v3020_v16 = vadd.f32 -1.0, %v3680_v33  ;;  %v1611_v21 = vmul.f32 1.6732632, %v3017_v55  ;;  %v3540_v59 = vld [vmem:[#allocation10 + $0x60] ss:$8 sps:$4 sm:$0xff]   ;;  %2449 = vmatprep.subr.bf16.mxu0 %v3542_v44 }
 0x38f   : > { %1906 = vmatprep.mubr.bf16.mxu0 %v1694_v61  ;;  %v1613_v14 = vmul.f32 1.6732632, %v3019_v18  ;;  %v1644_v20 = vsel %vm1484_vm8, %v4811_v39, %v1612_v4  ;;  %v3543_v57 = vld [vmem:[#allocation10 + $0x50] ss:$8 sps:$4 sm:$0xff]   ;;  %v3548_v53 = vld [vmem:[#allocation10 + $0x44] ss:$8 sps:$4 sm:$0xff]  }
 0x390   : > { %v1614_v29 = vmul.f32 1.6732632, %v3020_v16  ;;  %v1676_v26 = vmul.f32 1.050701, %v1644_v20  ;;  %v1643_v30 = vsel %vm1483_vm11, %v4808_v0, %v1611_v21  ;;  %v4893_v54 = vld [vmem:[%s5163_s10] ss:$0 sm:$0xff] }
 0x391   : > { %v3682_v63 = vpop.eup %3681  ;;  %v1645_v37 = vsel %vm1485_vm10, %v4823_v56, %v1613_v14  ;;  %2450 = vmatpush1.bf16.msra.mxu0 %v3540_v59 }
 0x392   : > { %v3684_v24 = vpop.eup %3683  ;;  %v1646_v52 = vsel %vm1486_vm9, %v4832_v11, %v1614_v29  ;;  %v3022_v19 = vadd.f32 -1.0, %v3682_v63  ;;  %1907 = vmatmul.mubr.bf16.gmra.mxu0 %v1693_v25  ;;  %v1677_v38 = vmul.f32 1.050701, %v1645_v37  ;;  %v1675_v11 = vmul.f32 1.050701, %v1643_v30  ;;  %2451 = vmatprep.subr.bf16.mxu0 %v3545_v58 }
 0x393   : > { %v1678_v28 = vmul.f32 1.050701, %v1646_v52  ;;  %v3021_v32 = vadd.f32 -1.0, %v3684_v24 }
 0x394   : > { %v3686_v39 = vpop.eup %3685  ;;  %v1616_v35 = vmul.f32 1.6732632, %v3022_v19  ;;  %v1695_v0 = vpack.c.bf16 %v1677_v38, %v1675_v11 }
 0x395   : > { %v1696_v22 = vpack.c.bf16 %v1678_v28, %v1676_v26  ;;  %v3688_v60 = vpop.eup %3687  ;;  %v3023_v2 = vadd.f32 -1.0, %v3686_v39  ;;  %v1615_v56 = vmul.f32 1.6732632, %v3021_v32  ;;  %2452 = vmatpush1.bf16.msra.mxu0 %v3543_v57 }
 0x396   : > { %v3024_v43 = vadd.f32 -1.0, %v3688_v60  ;;  %v1648_v36 = vsel %vm1488_vm12, %v4846_v1, %v1616_v35  ;;  %2453 = vmatprep.subr.bf16.mxu0 %v3548_v53 }
 0x397   : > { %1914 = vmatprep.mubr.bf16.mxu0 %v1696_v22  ;;  %v1617_v27 = vmul.f32 1.6732632, %v3023_v2  ;;  %v1680_v6 = vmul.f32 1.050701, %v1648_v36  ;;  %v1647_v41 = vsel %vm1487_vm15, %v4839_v51, %v1615_v56  ;;  %v3536_v51 = vld [vmem:[#allocation11] sm:$0xff]  }
 0x398   : > { %v1618_v17 = vmul.f32 1.6732632, %v3024_v43  ;;  %v1679_v1 = vmul.f32 1.050701, %v1647_v41 }
 0x399   : > { %v1649_v23 = vsel %vm1489_vm13, %v4854_v42, %v1617_v27  ;;  %v3533_v42 = vld [vmem:[#allocation11 + $0x18] sm:$0xff]   ;;  %2454 = vmatpush1.bf16.msra.mxu0 %v3546_v62 }
 0x39a   : > { %v1650_v46 = vsel %vm1490_vm14, %v4857_v45, %v1618_v17  ;;  %1915 = vmatmul.mubr.bf16.gmra.mxu0 %v1695_v0  ;;  %v1681_v50 = vmul.f32 1.050701, %v1649_v23  ;;  %3309 = vmatprep.subr.bf16.mxu1 %v3533_v42  ;;  %v3534_v45 = vld [vmem:[#allocation11 + $0x10] sm:$0xff]  }
 0x39b   : > { %v1682_v48 = vmul.f32 1.050701, %v1650_v46  ;;  %3310 = vmatpush3.bf16.msra.mxu1 %v3533_v42 }
 0x39c   : > { %v1697_v9 = vpack.c.bf16 %v1681_v50, %v1679_v1  ;;  %3311 = vmatprep.subr.bf16.mxu1 %v3534_v45 }
 0x39d   : > { %v1698_v10 = vpack.c.bf16 %v1682_v48, %v1680_v6 }
 0x39f   : > { %1922 = vmatprep.mubr.bf16.mxu0 %v1698_v10  ;;  %3312 = vmatpush3.bf16.msra.mxu1 %v3534_v45 }
 0x3a0   : > { %3313 = vmatprep.subr.bf16.mxu1 %v3535_v12 }
 0x3a2   : > { %1923 = vmatmul.mubr.bf16.gmra.mxu0 %v1697_v9 }
 0x3a3   : > { %2479 = vmatprep.mubr.bf16.mxu0 %v4156_v8  ;;  %3314 = vmatpush3.bf16.msra.mxu1 %v3535_v12 }
 0x3a4   : > { %3315 = vmatprep.subr.bf16.mxu1 %v3536_v51 }
 0x3a7   : > { %3316 = vmatpush3.bf16.msra.mxu1 %v3536_v51 }
 0x428   : > { %v3205_v61 = vpop.f32.mrf.mxu0 }
 0x42a   : > { %v3206_v40 = vpop.f32.mrf.mxu0 }
 0x42b   : > { %v3207_v4 = vadd.f32 %v3206_v40, %v3205_v61 }
 0x42c   : > { %v3208_v18 = vpop.f32.mrf.mxu0 }
 0x42d   : > { %v1869_v33 = vadd.f32 %v3207_v4, %v4893_v54 }
 0x42e   : > { %v3209_v5 = vpop.f32.mrf.mxu0 }
 0x42f   : > { %v1947_v55 = vmul.f32 1.442695, %v1869_v33  ;;  %v3210_v7 = vadd.f32 %v3209_v5, %v3208_v18  ;;  %vm1931_vm0 = vcmp.gt.f32.partialorder %v1869_v33, 0.0 }
 0x430   : > { %v3211_v16 = vpop.f32.mrf.mxu0 }
 0x431   : > { %3689 = vpow2.f32 %v1947_v55  ;;  %v1872_v14 = vadd.f32 %v3210_v7, %v4893_v54 }
 0x432   : > { %v3212_v15 = vpop.f32.mrf.mxu0 }
 0x433   : > { %v1949_v20 = vmul.f32 1.442695, %v1872_v14  ;;  %v3213_v29 = vadd.f32 %v3212_v15, %v3211_v16  ;;  %vm1932_vm1 = vcmp.gt.f32.partialorder %v1872_v14, 0.0 }
 0x434   : > { %v3214_v63 = vpop.f32.mrf.mxu0 }
 0x435   : > { %3691 = vpow2.f32 %v1949_v20  ;;  %v1877_v21 = vadd.f32 %v3213_v29, %v4893_v54 }
 0x436   : > { %v3215_v24 = vpop.f32.mrf.mxu0 }
 0x437   : > { %v1951_v52 = vmul.f32 1.442695, %v1877_v21  ;;  %v3216_v19 = vadd.f32 %v3215_v24, %v3214_v63  ;;  %vm1933_vm2 = vcmp.gt.f32.partialorder %v1877_v21, 0.0 }
 0x439   : > { %3693 = vpow2.f32 %v1951_v52  ;;  %v1880_v25 = vadd.f32 %v3216_v19, %v4893_v54  ;;  %v3217_v37 = vpop.f32.mrf.mxu0 }
 0x43b   : > { %v1953_v26 = vmul.f32 1.442695, %v1880_v25  ;;  %v3218_v28 = vpop.f32.mrf.mxu0  ;;  %vm1934_vm3 = vcmp.gt.f32.partialorder %v1880_v25, 0.0 }
 0x43c   : > { %v3219_v30 = vadd.f32 %v3218_v28, %v3217_v37 }
 0x43d   : > { %3695 = vpow2.f32 %v1953_v26  ;;  %v3220_v35 = vpop.f32.mrf.mxu0 }
 0x43e   : > { %v3690_v39 = vpop.eup %3689  ;;  %v4900_v22 = vadd.f32 %v3219_v30, %v4893_v54 }
 0x43f   : > { %v3042_v32 = vadd.f32 -1.0, %v3690_v39  ;;  %v3221_v60 = vpop.f32.mrf.mxu0 }
 0x440   : > { %v1955_v43 = vmul.f32 1.442695, %v4900_v22  ;;  %v3222_v11 = vadd.f32 %v3221_v60, %v3220_v35  ;;  %vm1935_vm4 = vcmp.gt.f32.partialorder %v4900_v22, 0.0 }
 0x441   : > { %v1995_v38 = vmul.f32 1.6732632, %v3042_v32 }
 0x442   : > { %v3692_v2 = vpop.eup %3691  ;;  %3697 = vpow2.f32 %v1955_v43  ;;  %v4904_v56 = vadd.f32 %v3222_v11, %v4893_v54  ;;  %v3223_v36 = vpop.f32.mrf.mxu0 }
 0x443   : > { %v3043_v27 = vadd.f32 -1.0, %v3692_v2  ;;  %v2011_v0 = vsel %vm1931_vm0, %v1869_v33, %v1995_v38 }
 0x444   : > { %v1957_v46 = vmul.f32 1.442695, %v4904_v56  ;;  %v3224_v48 = vpop.f32.mrf.mxu0  ;;  %v2027_v10 = vmul.f32 1.050701, %v2011_v0  ;;  %vm1936_vm5 = vcmp.gt.f32.partialorder %v4904_v56, 0.0 }
 0x445   : > { %v1996_v17 = vmul.f32 1.6732632, %v3043_v27  ;;  %v3225_v50 = vadd.f32 %v3224_v48, %v3223_v36 }
 0x446   : > { %v3694_v23 = vpop.eup %3693  ;;  %3699 = vpow2.f32 %v1957_v46  ;;  %v3226_v3 = vpop.f32.mrf.mxu0 }
 0x447   : > { %v3044_v6 = vadd.f32 -1.0, %v3694_v23  ;;  %v2012_v41 = vsel %vm1932_vm1, %v1872_v14, %v1996_v17  ;;  %v4908_v45 = vadd.f32 %v3225_v50, %v4893_v54 }
 0x448   : > { %v2028_v1 = vmul.f32 1.050701, %v2012_v41  ;;  %v3227_v13 = vpop.f32.mrf.mxu0 }
 0x449   : > { %v1997_v9 = vmul.f32 1.6732632, %v3044_v6  ;;  %v1959_v31 = vmul.f32 1.442695, %v4908_v45  ;;  %v3228_v44 = vadd.f32 %v3227_v13, %v3226_v3  ;;  %vm1937_vm6 = vcmp.gt.f32.partialorder %v4908_v45, 0.0 }
 0x44a   : > { %v3696_v42 = vpop.eup %3695  ;;  %v2043_v12 = vpack.c.bf16 %v2028_v1, %v2027_v10  ;;  %v3229_v57 = vpop.f32.mrf.mxu0 }
 0x44b   : > { %v3045_v51 = vadd.f32 -1.0, %v3696_v42  ;;  %v2013_v59 = vsel %vm1933_vm2, %v1877_v21, %v1997_v9  ;;  %3701 = vpow2.f32 %v1959_v31  ;;  %v4912_v53 = vadd.f32 %v3228_v44, %v4893_v54 }
 0x44c   : > { %3317 = vmatprep.mubr.bf16.mxu1 %v2043_v12  ;;  %v3230_v61 = vpop.f32.mrf.mxu0  ;;  %v2029_v40 = vmul.f32 1.050701, %v2013_v59 }
 0x44d   : > { %v1998_v58 = vmul.f32 1.6732632, %v3045_v51  ;;  %v1961_v18 = vmul.f32 1.442695, %v4912_v53  ;;  %v3231_v33 = vadd.f32 %v3230_v61, %v3229_v57  ;;  %vm1938_vm7 = vcmp.gt.f32.partialorder %v4912_v53, 0.0 }
 0x44e   : > { %v3232_v55 = vpop.f32.mrf.mxu0 }
 0x44f   : > { %v2014_v62 = vsel %vm1934_vm3, %v1880_v25, %v1998_v58  ;;  %v3698_v5 = vpop.eup %3697  ;;  %3703 = vpow2.f32 %v1961_v18  ;;  %v4916_v14 = vadd.f32 %v3231_v33, %v4893_v54 }
 0x450   : > { %v2030_v4 = vmul.f32 1.050701, %v2014_v62  ;;  %v3046_v16 = vadd.f32 -1.0, %v3698_v5  ;;  %v3233_v15 = vpop.f32.mrf.mxu0 }
 0x451   : > { %v1963_v20 = vmul.f32 1.442695, %v4916_v14  ;;  %v3234_v29 = vadd.f32 %v3233_v15, %v3232_v55  ;;  %vm1939_vm8 = vcmp.gt.f32.partialorder %v4916_v14, 0.0 }
 0x452   : > { %v2044_v7 = vpack.c.bf16 %v2030_v4, %v2029_v40  ;;  %v1999_v63 = vmul.f32 1.6732632, %v3046_v16  ;;  %v3235_v24 = vpop.f32.mrf.mxu0 }
 0x453   : > { %v3700_v21 = vpop.eup %3699  ;;  %3705 = vpow2.f32 %v1963_v20  ;;  %v4920_v19 = vadd.f32 %v3234_v29, %v4893_v54 }
 0x454   : > { %3318 = vmatmul.mubr.bf16.vlgmr.msra.gmra.mxu1 %v2044_v7  ;;  %v3047_v52 = vadd.f32 -1.0, %v3700_v21  ;;  %v3236_v25 = vpop.f32.mrf.mxu0  ;;  %v2015_v39 = vsel %vm1935_vm4, %v4900_v22, %v1999_v63 }
 0x455   : > { %v1965_v26 = vmul.f32 1.442695, %v4920_v19  ;;  %v3237_v37 = vadd.f32 %v3236_v25, %v3235_v24  ;;  %v2031_v2 = vmul.f32 1.050701, %v2015_v39  ;;  %vm1940_vm9 = vcmp.gt.f32.partialorder %v4920_v19, 0.0 }
 0x456   : > { %v2000_v28 = vmul.f32 1.6732632, %v3047_v52  ;;  %v3238_v30 = vpop.f32.mrf.mxu0 }
 0x457   : > { %3707 = vpow2.f32 %v1965_v26  ;;  %v4927_v32 = vadd.f32 %v3237_v37, %v4893_v54 }
 0x458   : > { %v2016_v35 = vsel %vm1936_vm5, %v4904_v56, %v2000_v28  ;;  %v3702_v60 = vpop.eup %3701  ;;  %v3239_v38 = vpop.f32.mrf.mxu0 }
 0x459   : > { %v2032_v43 = vmul.f32 1.050701, %v2016_v35  ;;  %v3048_v11 = vadd.f32 -1.0, %v3702_v60  ;;  %v1967_v27 = vmul.f32 1.442695, %v4927_v32  ;;  %v3240_v36 = vadd.f32 %v3239_v38, %v3238_v30 }
 0x45a   : > { %v3241_v17 = vpop.f32.mrf.mxu0  ;;  %vm1941_vm10 = vcmp.gt.f32.partialorder %v4927_v32, 0.0 }
 0x45b   : > { %v2045_v0 = vpack.c.bf16 %v2032_v43, %v2031_v2  ;;  %3709 = vpow2.f32 %v1967_v27  ;;  %v4932_v22 = vadd.f32 %v3240_v36, %v4893_v54  ;;  %v2001_v41 = vmul.f32 1.6732632, %v3048_v11 }
 0x45c   : > { %v3704_v23 = vpop.eup %3703  ;;  %v3242_v46 = vpop.f32.mrf.mxu0 }
 0x45d   : > { %3321 = vmatprep.mubr.bf16.mxu1 %v2045_v0  ;;  %v3049_v6 = vadd.f32 -1.0, %v3704_v23  ;;  %v1969_v56 = vmul.f32 1.442695, %v4932_v22  ;;  %v3243_v48 = vadd.f32 %v3242_v46, %v3241_v17  ;;  %v2017_v13 = vsel %vm1937_vm6, %v4908_v45, %v2001_v41 }
 0x45e   : > { %v3244_v50 = vpop.f32.mrf.mxu0  ;;  %v2033_v40 = vmul.f32 1.050701, %v2017_v13  ;;  %vm1942_vm11 = vcmp.gt.f32.partialorder %v4932_v22, 0.0  ;;  %v3551_v13 = vld [vmem:[#allocation10 + $0x34] ss:$8 sps:$4 sm:$0xff]  }
 0x45f   : > { %3711 = vpow2.f32 %v1969_v56  ;;  %v4936_v10 = vadd.f32 %v3243_v48, %v4893_v54  ;;  %v2002_v1 = vmul.f32 1.6732632, %v3049_v6  ;;  %2455 = vmatprep.subr.bf16.mxu0 %v3551_v13 }
 0x460   : > { %v3706_v9 = vpop.eup %3705  ;;  %v3245_v3 = vpop.f32.mrf.mxu0 }
 0x461   : > { %v3050_v42 = vadd.f32 -1.0, %v3706_v9  ;;  %v1971_v12 = vmul.f32 1.442695, %v4936_v10  ;;  %v3246_v51 = vadd.f32 %v3245_v3, %v3244_v50  ;;  %v2018_v44 = vsel %vm1938_vm7, %v4912_v53, %v2002_v1 }
 0x462   : > { %v3247_v31 = vpop.f32.mrf.mxu0  ;;  %v2034_v58 = vmul.f32 1.050701, %v2018_v44  ;;  %vm1943_vm12 = vcmp.gt.f32.partialorder %v4936_v10, 0.0  ;;  %v3552_v44 = vld [vmem:[#allocation10 + $0x20] ss:$8 sps:$4 sm:$0xff]  }
 0x463   : > { %3713 = vpow2.f32 %v1971_v12  ;;  %v1920_v59 = vadd.f32 %v3246_v51, %v4893_v54  ;;  %v2003_v57 = vmul.f32 1.6732632, %v3050_v42 }
 0x464   : > { %v3708_v62 = vpop.eup %3707  ;;  %v3248_v61 = vpop.f32.mrf.mxu0  ;;  %v2046_v55 = vpack.c.bf16 %v2034_v58, %v2033_v40  ;;  %v3555_v58 = vld [vmem:[#allocation10 + $0x10] ss:$8 sps:$4 sm:$0xff]  }
 0x465   : > { %v3051_v4 = vadd.f32 -1.0, %v3708_v62  ;;  %v1973_v18 = vmul.f32 1.442695, %v1920_v59  ;;  %v3249_v33 = vadd.f32 %v3248_v61, %v3247_v31  ;;  %v2019_v53 = vsel %vm1939_vm8, %v4916_v14, %v2003_v57  ;;  %v3554_v31 = vld [vmem:[#allocation10 + $0x24] ss:$8 sps:$4 sm:$0xff]  }
 0x466   : > { %v3250_v5 = vpop.f32.mrf.mxu0  ;;  %3322 = vmatmul.mubr.bf16.gmra.mxu1 %v2046_v55  ;;  %v2035_v24 = vmul.f32 1.050701, %v2019_v53  ;;  %vm1944_vm13 = vcmp.gt.f32.partialorder %v1920_v59, 0.0  ;;  %v3560_v57 = vld [vmem:[#allocation10 + $0x4] ss:$8 sps:$4 sm:$0xff]  }
 0x467   : > { %3715 = vpow2.f32 %v1973_v18  ;;  %v1925_v45 = vadd.f32 %v3249_v33, %v4893_v54  ;;  %v2004_v7 = vmul.f32 1.6732632, %v3051_v4  ;;  %v3558_v62 = vld [vmem:[#allocation10] ss:$8 sps:$4 sm:$0xff]  }
 0x468   : > { %v3710_v16 = vpop.eup %3709  ;;  %v3251_v15 = vpop.f32.mrf.mxu0  ;;  %v4959_v61 = vld [vmem:[%s5164_s11] ss:$0 sm:$0xff] }
 0x469   : > { %v3052_v20 = vadd.f32 -1.0, %v3710_v16  ;;  %v1975_v29 = vmul.f32 1.442695, %v1925_v45  ;;  %v3252_v63 = vadd.f32 %v3251_v15, %v3250_v5  ;;  %v2020_v21 = vsel %vm1940_vm9, %v4920_v19, %v2004_v7 }
 0x46a   : > { %v2036_v25 = vmul.f32 1.050701, %v2020_v21  ;;  %vm1945_vm14 = vcmp.gt.f32.partialorder %v1925_v45, 0.0 }
 0x46b   : > { %3717 = vpow2.f32 %v1975_v29  ;;  %v1928_v52 = vadd.f32 %v3252_v63, %v4893_v54  ;;  %v2005_v26 = vmul.f32 1.6732632, %v3052_v20 }
 0x46c   : > { %v3712_v37 = vpop.eup %3711  ;;  %v2047_v14 = vpack.c.bf16 %v2036_v25, %v2035_v24 }
 0x46d   : > { %v3053_v28 = vadd.f32 -1.0, %v3712_v37  ;;  %v1977_v39 = vmul.f32 1.442695, %v1928_v52  ;;  %v2021_v35 = vsel %vm1941_vm10, %v4927_v32, %v2005_v26  ;;  %vm1946_vm15 = vcmp.gt.f32.partialorder %v1928_v52, 0.0 }
 0x46e   : > { %3325 = vmatprep.mubr.bf16.mxu1 %v2047_v14  ;;  %v2037_v54 = vmul.f32 1.050701, %v2021_v35 }
 0x46f   : > { %3719 = vpow2.f32 %v1977_v39  ;;  %v2006_v30 = vmul.f32 1.6732632, %v3053_v28 }
 0x470   : > { %v3714_v60 = vpop.eup %3713 }
 0x471   : > { %v3054_v19 = vadd.f32 -1.0, %v3714_v60  ;;  %v2022_v38 = vsel %vm1942_vm11, %v4932_v22, %v2006_v30 }
 0x472   : > { %v2038_v2 = vmul.f32 1.050701, %v2022_v38 }
 0x473   : > { %v2007_v43 = vmul.f32 1.6732632, %v3054_v19 }
 0x474   : > { %v3716_v11 = vpop.eup %3715  ;;  %v2048_v27 = vpack.c.bf16 %v2038_v2, %v2037_v54 }
 0x475   : > { %v3055_v36 = vadd.f32 -1.0, %v3716_v11  ;;  %v2023_v0 = vsel %vm1943_vm12, %v4936_v10, %v2007_v43  ;;  %v3549_v10 = vld [vmem:[#allocation10 + $0x30] ss:$8 sps:$4 sm:$0xff]  }
 0x476   : > { %3326 = vmatmul.mubr.bf16.gmra.mxu1 %v2048_v27  ;;  %v2039_v6 = vmul.f32 1.050701, %v2023_v0  ;;  %2456 = vmatpush1.bf16.msra.mxu0 %v3549_v10 }
 0x477   : > { %v2008_v17 = vmul.f32 1.6732632, %v3055_v36  ;;  %2457 = vmatprep.subr.bf16.mxu0 %v3554_v31 }
 0x478   : > { %v3718_v23 = vpop.eup %3717 }
 0x479   : > { %v3056_v32 = vadd.f32 -1.0, %v3718_v23  ;;  %v2024_v46 = vsel %vm1944_vm13, %v1920_v59, %v2008_v17  ;;  %v3557_v59 = vld [vmem:[#allocation10 + $0x14] ss:$8 sps:$4 sm:$0xff]  }
 0x47a   : > { %v2040_v56 = vmul.f32 1.050701, %v2024_v46  ;;  %2458 = vmatpush1.bf16.msra.mxu0 %v3552_v44 }
 0x47b   : > { %v2009_v48 = vmul.f32 1.6732632, %v3056_v32  ;;  %2459 = vmatprep.subr.bf16.mxu0 %v3557_v59 }
 0x47c   : > { %v3720_v22 = vpop.eup %3719  ;;  %v2049_v41 = vpack.c.bf16 %v2040_v56, %v2039_v6 }
 0x47d   : > { %v3057_v50 = vadd.f32 -1.0, %v3720_v22  ;;  %v2025_v9 = vsel %vm1945_vm14, %v1925_v45, %v2009_v48 }
 0x47e   : > { %3329 = vmatprep.mubr.bf16.mxu1 %v2049_v41  ;;  %v2041_v42 = vmul.f32 1.050701, %v2025_v9  ;;  %2460 = vmatpush1.bf16.msra.mxu0 %v3555_v58 }
 0x47f   : > { %v2010_v1 = vmul.f32 1.6732632, %v3057_v50  ;;  %2461 = vmatprep.subr.bf16.mxu0 %v3560_v57 }
 0x481   : > { %v2026_v3 = vsel %vm1946_vm15, %v1928_v52, %v2010_v1 }
 0x482   : > { %v2042_v12 = vmul.f32 1.050701, %v2026_v3  ;;  %2462 = vmatpush1.bf16.msra.mxu0 %v3558_v62 }
 0x484   : > { %v2050_v51 = vpack.c.bf16 %v2042_v12, %v2041_v42 }
 0x486   : > { %3330 = vmatmul.mubr.bf16.gmra.mxu1 %v2050_v51 }
 0x514   : > { %v3319_v40 = vpop.f32.mrf.mxu1 }
 0x515   : > { %v2165_v4 = vadd.f32 %v3319_v40, %v4959_v61 }
 0x516   : > { %v2156_v18 = vpop.f32.mrf.mxu1 }
 0x517   : > { %v2157_v33 = vadd.f32 %v4959_v61, %v2156_v18  ;;  %v2239_v7 = vmul.f32 1.442695, %v2165_v4  ;;  %vm2221_vm3 = vcmp.gt.f32.partialorder %v2165_v4, 0.0 }
 0x518   : > { %v3320_v5 = vpop.f32.mrf.mxu1 }
 0x519   : > { %v2235_v55 = vmul.f32 1.442695, %v2157_v33  ;;  %v2168_v45 = vadd.f32 %v3320_v5, %v4959_v61  ;;  %vm2219_vm0 = vcmp.gt.f32.partialorder %v2157_v33, 0.0 }
 0x51a   : > { %v2159_v53 = vpop.f32.mrf.mxu1 }
 0x51b   : > { %3721 = vpow2.f32 %v2235_v55  ;;  %v2241_v16 = vmul.f32 1.442695, %v2168_v45  ;;  %v2160_v15 = vadd.f32 %v4959_v61, %v2159_v53  ;;  %vm2222_vm2 = vcmp.gt.f32.partialorder %v2168_v45, 0.0 }
 0x51d   : > { %3723 = vpow2.f32 %v2241_v16  ;;  %v2237_v20 = vmul.f32 1.442695, %v2160_v15  ;;  %vm2220_vm1 = vcmp.gt.f32.partialorder %v2160_v15, 0.0 }
 0x51e   : > { %3725 = vpow2.f32 %v2239_v7 }
 0x51f   : > { %3727 = vpow2.f32 %v2237_v20 }
 0x526   : > { %v3323_v25 = vpop.f32.mrf.mxu1 }
 0x527   : > { %v4966_v37 = vadd.f32 %v3323_v25, %v4959_v61 }
 0x528   : > { %v3722_v29 = vpop.eup %3721  ;;  %v2172_v14 = vpop.f32.mrf.mxu1 }
 0x529   : > { %v3067_v63 = vadd.f32 -1.0, %v3722_v29  ;;  %v2173_v30 = vadd.f32 %v4959_v61, %v2172_v14  ;;  %v2247_v54 = vmul.f32 1.442695, %v4966_v37  ;;  %vm2225_vm7 = vcmp.gt.f32.partialorder %v4966_v37, 0.0 }
 0x52a   : > { %v3724_v21 = vpop.eup %3723  ;;  %v3324_v38 = vpop.f32.mrf.mxu1 }
 0x52b   : > { %v3726_v24 = vpop.eup %3725  ;;  %v2283_v52 = vmul.f32 1.6732632, %v3067_v63  ;;  %v3070_v28 = vadd.f32 -1.0, %v3724_v21  ;;  %v2243_v2 = vmul.f32 1.442695, %v2173_v30  ;;  %v4971_v27 = vadd.f32 %v3324_v38, %v4959_v61 }
 0x52c   : > { %v3728_v26 = vpop.eup %3727  ;;  %v3069_v35 = vadd.f32 -1.0, %v3726_v24  ;;  %v2175_v36 = vpop.f32.mrf.mxu1  ;;  %vm2223_vm4 = vcmp.gt.f32.partialorder %v2173_v30, 0.0 }
 0x52d   : > { %v3068_v39 = vadd.f32 -1.0, %v3728_v26  ;;  %v2299_v60 = vsel %vm2219_vm0, %v2157_v33, %v2283_v52  ;;  %v2286_v43 = vmul.f32 1.6732632, %v3070_v28  ;;  %3729 = vpow2.f32 %v2243_v2 }
 0x52e   : > { %v2315_v17 = vmul.f32 1.050701, %v2299_v60  ;;  %v2176_v23 = vadd.f32 %v4959_v61, %v2175_v36  ;;  %v2285_v32 = vmul.f32 1.6732632, %v3069_v35  ;;  %v2249_v46 = vmul.f32 1.442695, %v4971_v27 }
 0x52f   : > { %v2284_v19 = vmul.f32 1.6732632, %v3068_v39  ;;  %3731 = vpow2.f32 %v2247_v54  ;;  %v2302_v48 = vsel %vm2222_vm2, %v2168_v45, %v2286_v43  ;;  %vm2226_vm6 = vcmp.gt.f32.partialorder %v4971_v27, 0.0 }
 0x530   : > { %v2245_v56 = vmul.f32 1.442695, %v2176_v23  ;;  %3733 = vpow2.f32 %v2249_v46  ;;  %v2301_v22 = vsel %vm2221_vm3, %v2165_v4, %v2285_v32  ;;  %v2318_v41 = vmul.f32 1.050701, %v2302_v48 }
 0x531   : > { %v2300_v11 = vsel %vm2220_vm1, %v2160_v15, %v2284_v19  ;;  %v2317_v1 = vmul.f32 1.050701, %v2301_v22  ;;  %vm2224_vm5 = vcmp.gt.f32.partialorder %v2176_v23, 0.0 }
 0x532   : > { %v2316_v0 = vmul.f32 1.050701, %v2300_v11  ;;  %3735 = vpow2.f32 %v2245_v56 }
 0x533   : > { %v2332_v42 = vpack.c.bf16 %v2318_v41, %v2317_v1 }
 0x534   : > { %v2331_v6 = vpack.c.bf16 %v2316_v0, %v2315_v17 }
 0x536   : > { %2480 = vmatmul.mubr.bf16.vlgmr.msra.gmra.mxu0 %v2331_v6  ;;  %v3327_v50 = vpop.f32.mrf.mxu1 }
 0x537   : > { %2489 = vmatprep.mubr.bf16.mxu0 %v4156_v8  ;;  %v4980_v51 = vadd.f32 %v3327_v50, %v4959_v61 }
 0x538   : > { %v2188_v9 = vpop.f32.mrf.mxu1 }
 0x539   : > { %v4977_v3 = vadd.f32 %v4959_v61, %v2188_v9  ;;  %v2255_v18 = vmul.f32 1.442695, %v4980_v51  ;;  %vm2229_vm11 = vcmp.gt.f32.partialorder %v4980_v51, 0.0 }
 0x53a   : > { %v3328_v12 = vpop.f32.mrf.mxu1  ;;  %v3730_v13 = vpop.eup %3729 }
 0x53b   : > { %v2251_v10 = vmul.f32 1.442695, %v4977_v3  ;;  %v4984_v31 = vadd.f32 %v3328_v12, %v4959_v61  ;;  %v3071_v59 = vadd.f32 -1.0, %v3730_v13  ;;  %vm2227_vm8 = vcmp.gt.f32.partialorder %v4977_v3, 0.0 }
 0x53c   : > { %v2191_v44 = vpop.f32.mrf.mxu1  ;;  %v3732_v57 = vpop.eup %3731 }
 0x53d   : > { %3737 = vpow2.f32 %v2251_v10  ;;  %v4988_v58 = vadd.f32 %v4959_v61, %v2191_v44  ;;  %v2257_v62 = vmul.f32 1.442695, %v4984_v31  ;;  %v3734_v40 = vpop.eup %3733  ;;  %v2287_v4 = vmul.f32 1.6732632, %v3071_v59 }
 0x53e   : > { %2490 = vmatmul.mubr.bf16.gmra.mxu0 %v2332_v42  ;;  %v3074_v55 = vadd.f32 -1.0, %v3734_v40  ;;  %v3073_v7 = vadd.f32 -1.0, %v3732_v57  ;;  %vm2230_vm10 = vcmp.gt.f32.partialorder %v4984_v31, 0.0 }
 0x53f   : > { %2499 = vmatprep.mubr.bf16.mxu0 %v4156_v8  ;;  %v2253_v33 = vmul.f32 1.442695, %v4988_v58  ;;  %v3736_v5 = vpop.eup %3735  ;;  %3739 = vpow2.f32 %v2257_v62  ;;  %v2303_v53 = vsel %vm2223_vm4, %v2173_v30, %v2287_v4  ;;  %vm2228_vm9 = vcmp.gt.f32.partialorder %v4988_v58, 0.0 }
 0x540   : > { %v3072_v45 = vadd.f32 -1.0, %v3736_v5  ;;  %v2290_v15 = vmul.f32 1.6732632, %v3074_v55  ;;  %v2319_v29 = vmul.f32 1.050701, %v2303_v53 }
 0x541   : > { %3741 = vpow2.f32 %v2253_v33  ;;  %v2289_v24 = vmul.f32 1.6732632, %v3073_v7 }
 0x542   : > { %v2288_v16 = vmul.f32 1.6732632, %v3072_v45  ;;  %3743 = vpow2.f32 %v2255_v18  ;;  %v2306_v26 = vsel %vm2226_vm6, %v4971_v27, %v2290_v15 }
 0x543   : > { %v2305_v30 = vsel %vm2225_vm7, %v4966_v37, %v2289_v24  ;;  %v2322_v19 = vmul.f32 1.050701, %v2306_v26 }
 0x544   : > { %v2304_v20 = vsel %vm2224_vm5, %v2176_v23, %v2288_v16  ;;  %v2321_v17 = vmul.f32 1.050701, %v2305_v30 }
 0x545   : > { %v2320_v63 = vmul.f32 1.050701, %v2304_v20 }
 0x546   : > { %v3331_v21 = vpop.f32.mrf.mxu1  ;;  %v2334_v6 = vpack.c.bf16 %v2322_v19, %v2321_v17 }
 0x547   : > { %v2333_v25 = vpack.c.bf16 %v2320_v63, %v2319_v29  ;;  %v4999_v60 = vadd.f32 %v3331_v21, %v4959_v61 }
 0x548   : > { %v2204_v52 = vpop.f32.mrf.mxu1 }
 0x549   : > { %v2205_v28 = vadd.f32 %v4959_v61, %v2204_v52  ;;  %2500 = vmatmul.mubr.bf16.gmra.mxu0 %v2333_v25  ;;  %v2263_v0 = vmul.f32 1.442695, %v4999_v60  ;;  %vm2233_vm15 = vcmp.gt.f32.partialorder %v4999_v60, 0.0  ;;  %v2355_v25 = vld [vmem:[%s5165_s12] sm:$0x3] }
 0x54a   : > { %v3738_v39 = vpop.eup %3737  ;;  %v3332_v14 = vpop.f32.mrf.mxu1  ;;  %2509 = vmatprep.mubr.bf16.mxu0 %v4156_v8  ;;  %v5029_v26 = vrot.slane %v2355_v25, %v1258_v47 }
 0x54b   : > { %v3075_v35 = vadd.f32 -1.0, %v3738_v39  ;;  %v2259_v38 = vmul.f32 1.442695, %v2205_v28  ;;  %v5003_v54 = vadd.f32 %v3332_v14, %v4959_v61  ;;  %vm2231_vm12 = vcmp.gt.f32.partialorder %v2205_v28, 0.0 }
 0x54c   : > { %v2207_v2 = vpop.f32.mrf.mxu1  ;;  %v3740_v43 = vpop.eup %3739 }
 0x54d   : > { %v2291_v11 = vmul.f32 1.6732632, %v3075_v35  ;;  %v2208_v27 = vadd.f32 %v4959_v61, %v2207_v2  ;;  %3745 = vpow2.f32 %v2259_v38  ;;  %v2265_v23 = vmul.f32 1.442695, %v5003_v54 }
 0x54e   : > { %v3742_v36 = vpop.eup %3741  ;;  %v3078_v48 = vadd.f32 -1.0, %v3740_v43  ;;  %vm2234_vm14 = vcmp.gt.f32.partialorder %v5003_v54, 0.0 }
 0x54f   : > { %v3076_v37 = vadd.f32 -1.0, %v3742_v36  ;;  %v3744_v32 = vpop.eup %3743  ;;  %v2261_v46 = vmul.f32 1.442695, %v2208_v27  ;;  %v2307_v56 = vsel %vm2227_vm8, %v4977_v3, %v2291_v11  ;;  %3747 = vpow2.f32 %v2265_v23 }
 0x550   : > { %v3077_v61 = vadd.f32 -1.0, %v3744_v32  ;;  %v2323_v50 = vmul.f32 1.050701, %v2307_v56  ;;  %v2294_v9 = vmul.f32 1.6732632, %v3078_v48  ;;  %vm2232_vm13 = vcmp.gt.f32.partialorder %v2208_v27, 0.0 }
 0x551   : > { %v2292_v22 = vmul.f32 1.6732632, %v3076_v37  ;;  %3749 = vpow2.f32 %v2261_v46  ;;  %2510 = vmatmul.mubr.bf16.gmra.mxu0 %v2334_v6 }
 0x552   : > { %3751 = vpow2.f32 %v2263_v0  ;;  %2519 = vmatprep.mubr.bf16.mxu0 %v4156_v8  ;;  %v2293_v12 = vmul.f32 1.6732632, %v3077_v61  ;;  %v2310_v3 = vsel %vm2230_vm10, %v4984_v31, %v2294_v9 }
 0x553   : > { %v2308_v41 = vsel %vm2228_vm9, %v4988_v58, %v2292_v22  ;;  %v2326_v44 = vmul.f32 1.050701, %v2310_v3 }
 0x554   : > { %v2324_v1 = vmul.f32 1.050701, %v2308_v41  ;;  %v2309_v13 = vsel %vm2229_vm11, %v4980_v51, %v2293_v12 }
 0x555   : > { %v2325_v57 = vmul.f32 1.050701, %v2309_v13 }
 0x556   : > { %v2335_v42 = vpack.c.bf16 %v2324_v1, %v2323_v50 }
 0x557   : > { %v2336_v33 = vpack.c.bf16 %v2326_v44, %v2325_v57 }
 0x559   : > { %2520 = vmatmul.mubr.bf16.gmra.mxu0 %v2335_v42 }
 0x55a   : > { %v3746_v10 = vpop.eup %3745  ;;  %2529 = vmatprep.mubr.bf16.mxu0 %v4156_v8 }
 0x55b   : > { %v3079_v59 = vadd.f32 -1.0, %v3746_v10 }
 0x55c   : > { %v3748_v58 = vpop.eup %3747 }
 0x55d   : > { %v2295_v62 = vmul.f32 1.6732632, %v3079_v59  ;;  %v3082_v5 = vadd.f32 -1.0, %v3748_v58 }
 0x55e   : > { %v3750_v40 = vpop.eup %3749 }
 0x55f   : > { %v3752_v4 = vpop.eup %3751  ;;  %v3080_v18 = vadd.f32 -1.0, %v3750_v40  ;;  %v2311_v31 = vsel %vm2231_vm12, %v2205_v28, %v2295_v62  ;;  %v2298_v53 = vmul.f32 1.6732632, %v3082_v5  ;;  %v5033_v28 = vrot.slane %v2355_v25, %v1262_v49 }
 0x560   : > { %v3081_v45 = vadd.f32 -1.0, %v3752_v4  ;;  %v2327_v7 = vmul.f32 1.050701, %v2311_v31 }
 0x561   : > { %v2296_v55 = vmul.f32 1.6732632, %v3080_v18  ;;  %2530 = vmatmul.mubr.bf16.gmra.mxu0 %v2336_v33  ;;  %v2314_v29 = vsel %vm2234_vm14, %v5003_v54, %v2298_v53 }
 0x562   : > { %2539 = vmatprep.mubr.bf16.mxu0 %v4156_v8  ;;  %v2297_v15 = vmul.f32 1.6732632, %v3081_v45  ;;  %v2330_v21 = vmul.f32 1.050701, %v2314_v29 }
 0x563   : > { %v2312_v51 = vsel %vm2232_vm13, %v2208_v27, %v2296_v55 }
 0x564   : > { %v2328_v16 = vmul.f32 1.050701, %v2312_v51  ;;  %v2313_v63 = vsel %vm2233_vm15, %v4999_v60, %v2297_v15 }
 0x565   : > { %v2329_v24 = vmul.f32 1.050701, %v2313_v63 }
 0x566   : > { %v2337_v20 = vpack.c.bf16 %v2328_v16, %v2327_v7 }
 0x567   : > { %v2338_v52 = vpack.c.bf16 %v2330_v21, %v2329_v24 }
 0x569   : > { %2540 = vmatmul.mubr.bf16.gmra.mxu0 %v2337_v20 }
 0x56a   : > { %2549 = vmatprep.mubr.bf16.mxu0 %v4156_v8 }
 0x571   : > { %2550 = vmatmul.mubr.bf16.gmra.mxu0 %v2338_v52 }
 0x5f6   : > { %v2481_v39 = vpop.f32.mrf.mxu0 }
 0x5f7   : > { %v2482_v14 = vadd.f32 %v2481_v39, %v5029_v26 }
 0x5f8   : > { %v2483_v8 = vpop.f32.mrf.mxu0 }
 0x5f9   : > { %v2560_v30 = vsub.f32 0.0, %v2482_v14  ;;  %v2484_v35 = vadd.f32 %v2483_v8, %v5033_v28 }
 0x5fa   : > { %v2485_v60 = vpop.f32.mrf.mxu0 }
 0x5fb   : > { %v2592_v19 = vmul.f32 1.442695, %v2560_v30  ;;  %v2561_v38 = vsub.f32 0.0, %v2484_v35  ;;  %v2486_v54 = vadd.f32 %v2485_v60, %v5029_v26 }
 0x5fc   : > { %v2487_v2 = vpop.f32.mrf.mxu0 }
 0x5fd   : > { %3753 = vpow2.f32 %v2592_v19  ;;  %v2594_v47 = vmul.f32 1.442695, %v2561_v38  ;;  %v2562_v43 = vsub.f32 0.0, %v2486_v54  ;;  %v2488_v34 = vadd.f32 %v2487_v2, %v5033_v28 }
 0x5fe   : > { %v2491_v49 = vpop.f32.mrf.mxu0 }
 0x5ff   : > { %3755 = vpow2.f32 %v2594_v47  ;;  %v2596_v11 = vmul.f32 1.442695, %v2562_v43  ;;  %v2563_v27 = vsub.f32 0.0, %v2488_v34  ;;  %v2492_v36 = vadd.f32 %v2491_v49, %v5029_v26 }
 0x600   : > { %v2493_v17 = vpop.f32.mrf.mxu0 }
 0x601   : > { %3757 = vpow2.f32 %v2596_v11  ;;  %v2598_v37 = vmul.f32 1.442695, %v2563_v27  ;;  %v2564_v0 = vsub.f32 0.0, %v2492_v36  ;;  %v2494_v23 = vadd.f32 %v2493_v17, %v5033_v28 }
 0x602   : > { %v2495_v32 = vpop.f32.mrf.mxu0 }
 0x603   : > { %3759 = vpow2.f32 %v2598_v37  ;;  %v2600_v46 = vmul.f32 1.442695, %v2564_v0  ;;  %v2565_v6 = vsub.f32 0.0, %v2494_v23  ;;  %v2496_v56 = vadd.f32 %v2495_v32, %v5029_v26 }
 0x604   : > { %v2497_v48 = vpop.f32.mrf.mxu0 }
 0x605   : > { %3761 = vpow2.f32 %v2600_v46  ;;  %v2602_v22 = vmul.f32 1.442695, %v2565_v6  ;;  %v2566_v61 = vsub.f32 0.0, %v2496_v56  ;;  %v2498_v41 = vadd.f32 %v2497_v48, %v5033_v28 }
 0x607   : > { %3763 = vpow2.f32 %v2602_v22  ;;  %v2604_v50 = vmul.f32 1.442695, %v2566_v61  ;;  %v2567_v1 = vsub.f32 0.0, %v2498_v41 }
 0x609   : > { %3765 = vpow2.f32 %v2604_v50  ;;  %v2606_v9 = vmul.f32 1.442695, %v2567_v1  ;;  %v2501_v13 = vpop.f32.mrf.mxu0 }
 0x60a   : > { %v3754_v42 = vpop.eup %3753  ;;  %v2502_v59 = vadd.f32 %v2501_v13, %v5029_v26 }
 0x60b   : > { %v2656_v12 = vadd.f32 1.0, %v3754_v42  ;;  %3767 = vpow2.f32 %v2606_v9  ;;  %v2503_v57 = vpop.f32.mrf.mxu0 }
 0x60c   : > { %v3756_v3 = vpop.eup %3755  ;;  %v2568_v40 = vsub.f32 0.0, %v2502_v59  ;;  %v2504_v4 = vadd.f32 %v2503_v57, %v5033_v28 }
 0x60d   : > { %3769 = vrcp.f32 %v2656_v12  ;;  %v2657_v10 = vadd.f32 1.0, %v3756_v3  ;;  %v2505_v33 = vpop.f32.mrf.mxu0 }
 0x60e   : > { %v3758_v44 = vpop.eup %3757  ;;  %v2608_v31 = vmul.f32 1.442695, %v2568_v40  ;;  %v2569_v55 = vsub.f32 0.0, %v2504_v4  ;;  %v2506_v45 = vadd.f32 %v2505_v33, %v5029_v26 }
 0x60f   : > { %3771 = vrcp.f32 %v2657_v10  ;;  %v2658_v58 = vadd.f32 1.0, %v3758_v44  ;;  %v2507_v7 = vpop.f32.mrf.mxu0 }
 0x610   : > { %v3760_v62 = vpop.eup %3759  ;;  %v2610_v16 = vmul.f32 1.442695, %v2569_v55  ;;  %v2570_v15 = vsub.f32 0.0, %v2506_v45  ;;  %v2508_v20 = vadd.f32 %v2507_v7, %v5033_v28 }
 0x611   : > { %3773 = vrcp.f32 %v2658_v58  ;;  %v2659_v18 = vadd.f32 1.0, %v3760_v62  ;;  %v2511_v63 = vpop.f32.mrf.mxu0 }
 0x612   : > { %v3762_v5 = vpop.eup %3761  ;;  %v2612_v24 = vmul.f32 1.442695, %v2570_v15  ;;  %v2571_v52 = vsub.f32 0.0, %v2508_v20  ;;  %v2512_v25 = vadd.f32 %v2511_v63, %v5029_v26 }
 0x613   : > { %3775 = vrcp.f32 %v2659_v18  ;;  %v2660_v51 = vadd.f32 1.0, %v3762_v5  ;;  %v2513_v14 = vpop.f32.mrf.mxu0 }
 0x614   : > { %v3764_v53 = vpop.eup %3763  ;;  %3777 = vpow2.f32 %v2608_v31  ;;  %v2614_v30 = vmul.f32 1.442695, %v2571_v52  ;;  %v2572_v35 = vsub.f32 0.0, %v2512_v25  ;;  %v2514_v60 = vadd.f32 %v2513_v14, %v5033_v28 }
 0x615   : > { %3779 = vrcp.f32 %v2660_v51  ;;  %v2661_v29 = vadd.f32 1.0, %v3764_v53  ;;  %v2515_v38 = vpop.f32.mrf.mxu0 }
 0x616   : > { %v3766_v21 = vpop.eup %3765  ;;  %3781 = vpow2.f32 %v2610_v16  ;;  %v2616_v2 = vmul.f32 1.442695, %v2572_v35  ;;  %v2573_v47 = vsub.f32 0.0, %v2514_v60  ;;  %v2516_v43 = vadd.f32 %v2515_v38, %v5029_v26 }
 0x617   : > { %3783 = vrcp.f32 %v2661_v29  ;;  %v2662_v39 = vadd.f32 1.0, %v3766_v21  ;;  %v2517_v34 = vpop.f32.mrf.mxu0 }
 0x618   : > { %v3768_v8 = vpop.eup %3767  ;;  %3785 = vpow2.f32 %v2612_v24  ;;  %v2618_v11 = vmul.f32 1.442695, %v2573_v47  ;;  %v2574_v27 = vsub.f32 0.0, %v2516_v43  ;;  %v2518_v36 = vadd.f32 %v2517_v34, %v5033_v28 }
 0x619   : > { %3787 = vrcp.f32 %v2662_v39  ;;  %v2663_v19 = vadd.f32 1.0, %v3768_v8  ;;  %v2521_v17 = vpop.f32.mrf.mxu0 }
 0x61a   : > { %v3770_v54 = vpop.eup %3769  ;;  %3789 = vpow2.f32 %v2614_v30  ;;  %v2620_v0 = vmul.f32 1.442695, %v2574_v27  ;;  %v2575_v23 = vsub.f32 0.0, %v2518_v36  ;;  %v2522_v32 = vadd.f32 %v2521_v17, %v5029_v26 }
 0x61b   : > { %2720 = vst [vmem:[%s5052_s18] sm:$0xff] %v3770_v54  ;;  %3791 = vrcp.f32 %v2663_v19  ;;  %v2523_v46 = vpop.f32.mrf.mxu0 }
 0x61c   : > { %v3772_v49 = vpop.eup %3771  ;;  %3793 = vpow2.f32 %v2616_v2  ;;  %v2622_v56 = vmul.f32 1.442695, %v2575_v23  ;;  %v2576_v48 = vsub.f32 0.0, %v2522_v32  ;;  %v2524_v22 = vadd.f32 %v2523_v46, %v5033_v28 }
 0x61d   : > { %2721 = vst [vmem:[%s5052_s18 + $0x8] sm:$0xff] %v3772_v49  ;;  %3795 = vpow2.f32 %v2618_v11  ;;  %v2525_v41 = vpop.f32.mrf.mxu0 }
 0x61e   : > { %v3774_v37 = vpop.eup %3773  ;;  %3797 = vpow2.f32 %v2620_v0  ;;  %v2624_v9 = vmul.f32 1.442695, %v2576_v48  ;;  %v2577_v42 = vsub.f32 0.0, %v2524_v22  ;;  %v2526_v3 = vadd.f32 %v2525_v41, %v5029_v26 }
 0x61f   : > { %2722 = vst [vmem:[%s5052_s18 + $0x10] sm:$0xff] %v3774_v37  ;;  %3799 = vpow2.f32 %v2622_v56  ;;  %v2527_v10 = vpop.f32.mrf.mxu0 }
 0x620   : > { %v3776_v6 = vpop.eup %3775  ;;  %v2626_v59 = vmul.f32 1.442695, %v2577_v42  ;;  %v2528_v58 = vadd.f32 %v2527_v10, %v5033_v28  ;;  %v2578_v62 = vsub.f32 0.0, %v2526_v3 }
 0x621   : > { %v3778_v61 = vpop.eup %3777  ;;  %2723 = vst [vmem:[%s5052_s18 + $0x18] sm:$0xff] %v3776_v6  ;;  %v2531_v40 = vpop.f32.mrf.mxu0 }
 0x622   : > { %v3780_v50 = vpop.eup %3779  ;;  %v2664_v1 = vadd.f32 1.0, %v3778_v61  ;;  %v2579_v33 = vsub.f32 0.0, %v2528_v58  ;;  %v2532_v5 = vadd.f32 %v2531_v40, %v5029_v26  ;;  %v2628_v55 = vmul.f32 1.442695, %v2578_v62 }
 0x623   : > { %v3782_v12 = vpop.eup %3781  ;;  %2724 = vst [vmem:[%s5052_s18 + $0x20] sm:$0xff] %v3780_v50  ;;  %v2533_v45 = vpop.f32.mrf.mxu0 }
 0x624   : > { %v3784_v13 = vpop.eup %3783  ;;  %3801 = vrcp.f32 %v2664_v1  ;;  %v2665_v44 = vadd.f32 1.0, %v3782_v12  ;;  %v2630_v53 = vmul.f32 1.442695, %v2579_v33  ;;  %v2580_v16 = vsub.f32 0.0, %v2532_v5 }
 0x625   : > { %v3786_v57 = vpop.eup %3785  ;;  %2725 = vst [vmem:[%s5052_s18 + $0x28] sm:$0xff] %v3784_v13  ;;  %3803 = vpow2.f32 %v2624_v9  ;;  %v2534_v20 = vadd.f32 %v2533_v45, %v5033_v28  ;;  %v2535_v29 = vpop.f32.mrf.mxu0 }
 0x626   : > { %v3788_v4 = vpop.eup %3787  ;;  %3805 = vrcp.f32 %v2665_v44  ;;  %v2666_v18 = vadd.f32 1.0, %v3786_v57  ;;  %v2632_v21 = vmul.f32 1.442695, %v2580_v16  ;;  %v2536_v24 = vadd.f32 %v2535_v29, %v5029_v26 }
 0x627   : > { %v3790_v31 = vpop.eup %3789  ;;  %2726 = vst [vmem:[%s5052_s18 + $0x30] sm:$0xff] %v3788_v4  ;;  %3807 = vpow2.f32 %v2626_v59  ;;  %v2581_v25 = vsub.f32 0.0, %v2534_v20  ;;  %v2537_v39 = vpop.f32.mrf.mxu0 }
 0x628   : > { %v3792_v51 = vpop.eup %3791  ;;  %3809 = vrcp.f32 %v2666_v18  ;;  %v2667_v7 = vadd.f32 1.0, %v3790_v31  ;;  %v2582_v8 = vsub.f32 0.0, %v2536_v24  ;;  %v2538_v30 = vadd.f32 %v2537_v39, %v5033_v28 }
 0x629   : > { %v3794_v15 = vpop.eup %3793  ;;  %2727 = vst [vmem:[%s5052_s18 + $0x38] sm:$0xff] %v3792_v51  ;;  %3811 = vpow2.f32 %v2628_v55  ;;  %v2634_v60 = vmul.f32 1.442695, %v2581_v25  ;;  %v2541_v19 = vpop.f32.mrf.mxu0 }
 0x62a   : > { %3813 = vrcp.f32 %v2667_v7  ;;  %v2668_v63 = vadd.f32 1.0, %v3794_v15  ;;  %v3796_v52 = vpop.eup %3795  ;;  %v2636_v54 = vmul.f32 1.442695, %v2582_v8  ;;  %v2583_v2 = vsub.f32 0.0, %v2538_v30 }
 0x62b   : > { %3815 = vpow2.f32 %v2630_v53  ;;  %v2669_v14 = vadd.f32 1.0, %v3796_v52  ;;  %v3798_v35 = vpop.eup %3797  ;;  %v2542_v43 = vadd.f32 %v2541_v19, %v5029_v26  ;;  %v2543_v34 = vpop.f32.mrf.mxu0 }
 0x62c   : > { %3817 = vrcp.f32 %v2668_v63  ;;  %v2670_v38 = vadd.f32 1.0, %v3798_v35  ;;  %v3800_v47 = vpop.eup %3799  ;;  %v2638_v11 = vmul.f32 1.442695, %v2583_v2  ;;  %v2544_v27 = vadd.f32 %v2543_v34, %v5033_v28 }
 0x62d   : > { %3819 = vpow2.f32 %v2632_v21  ;;  %v2671_v49 = vadd.f32 1.0, %v3800_v47  ;;  %v2584_v17 = vsub.f32 0.0, %v2542_v43  ;;  %v2545_v37 = vpop.f32.mrf.mxu0 }
 0x62e   : > { %3821 = vrcp.f32 %v2669_v14  ;;  %v2585_v23 = vsub.f32 0.0, %v2544_v27  ;;  %v2546_v32 = vadd.f32 %v2545_v37, %v5029_v26 }
 0x62f   : > { %3823 = vpow2.f32 %v2634_v60  ;;  %v2640_v56 = vmul.f32 1.442695, %v2584_v17  ;;  %v2547_v48 = vpop.f32.mrf.mxu0 }
 0x630   : > { %3825 = vrcp.f32 %v2670_v38  ;;  %v2642_v61 = vmul.f32 1.442695, %v2585_v23  ;;  %v2586_v41 = vsub.f32 0.0, %v2546_v32  ;;  %v2548_v50 = vadd.f32 %v2547_v48, %v5033_v28 }
 0x631   : > { %v3802_v36 = vpop.eup %3801  ;;  %3827 = vpow2.f32 %v2636_v54  ;;  %v2551_v42 = vpop.f32.mrf.mxu0 }
 0x632   : > { %v3804_v0 = vpop.eup %3803  ;;  %2728 = vst [vmem:[%s5052_s18 + $0x40] sm:$0xff] %v3802_v36  ;;  %3829 = vrcp.f32 %v2671_v49  ;;  %v2644_v3 = vmul.f32 1.442695, %v2586_v41  ;;  %v2587_v10 = vsub.f32 0.0, %v2548_v50  ;;  %v2552_v13 = vadd.f32 %v2551_v42, %v5029_v26 }
 0x633   : > { %v3806_v46 = vpop.eup %3805  ;;  %v2672_v6 = vadd.f32 1.0, %v3804_v0  ;;  %3831 = vpow2.f32 %v2638_v11  ;;  %v2553_v58 = vpop.f32.mrf.mxu0 }
 0x634   : > { %v3808_v22 = vpop.eup %3807  ;;  %2729 = vst [vmem:[%s5052_s18 + $0x48] sm:$0xff] %v3806_v46  ;;  %v2646_v62 = vmul.f32 1.442695, %v2587_v10  ;;  %v2588_v40 = vsub.f32 0.0, %v2552_v13  ;;  %v2554_v4 = vadd.f32 %v2553_v58, %v5033_v28 }
 0x635   : > { %v3810_v1 = vpop.eup %3809  ;;  %3833 = vrcp.f32 %v2672_v6  ;;  %v2673_v9 = vadd.f32 1.0, %v3808_v22  ;;  %v2555_v5 = vpop.f32.mrf.mxu0 }
 0x636   : > { %v3812_v12 = vpop.eup %3811  ;;  %2730 = vst [vmem:[%s5052_s18 + $0x50] sm:$0xff] %v3810_v1  ;;  %3835 = vpow2.f32 %v2640_v56  ;;  %v2648_v55 = vmul.f32 1.442695, %v2588_v40  ;;  %v2589_v45 = vsub.f32 0.0, %v2554_v4  ;;  %v2556_v51 = vadd.f32 %v2555_v5, %v5029_v26 }
 0x637   : > { %v3814_v44 = vpop.eup %3813  ;;  %3837 = vrcp.f32 %v2673_v9  ;;  %v2674_v59 = vadd.f32 1.0, %v3812_v12  ;;  %v2557_v16 = vpop.f32.mrf.mxu0 }
 0x638   : > { %v3816_v57 = vpop.eup %3815  ;;  %2731 = vst [vmem:[%s5052_s18 + $0x58] sm:$0xff] %v3814_v44  ;;  %3839 = vpow2.f32 %v2642_v61  ;;  %v2650_v20 = vmul.f32 1.442695, %v2589_v45  ;;  %v2590_v29 = vsub.f32 0.0, %v2556_v51  ;;  %v2558_v63 = vadd.f32 %v2557_v16, %v5033_v28 }
 0x639   : > { %v3818_v18 = vpop.eup %3817  ;;  %3841 = vrcp.f32 %v2674_v59  ;;  %v2675_v33 = vadd.f32 1.0, %v3816_v57 }
 0x63a   : > { %v3820_v31 = vpop.eup %3819  ;;  %2732 = vst [vmem:[%s5052_s18 + $0x60] sm:$0xff] %v3818_v18  ;;  %3843 = vpow2.f32 %v2644_v3  ;;  %v2652_v26 = vmul.f32 1.442695, %v2590_v29  ;;  %v2591_v25 = vsub.f32 0.0, %v2558_v63 }
 0x63b   : > { %v3822_v7 = vpop.eup %3821  ;;  %3845 = vrcp.f32 %v2675_v33  ;;  %v2676_v53 = vadd.f32 1.0, %v3820_v31 }
 0x63c   : > { %v3824_v15 = vpop.eup %3823  ;;  %2733 = vst [vmem:[%s5052_s18 + $0x68] sm:$0xff] %v3822_v7  ;;  %3847 = vpow2.f32 %v2646_v62  ;;  %v2654_v30 = vmul.f32 1.442695, %v2591_v25 }
 0x63d   : > { %v3826_v21 = vpop.eup %3825  ;;  %3849 = vrcp.f32 %v2676_v53  ;;  %v2677_v24 = vadd.f32 1.0, %v3824_v15 }
 0x63e   : > { %v3828_v52 = vpop.eup %3827  ;;  %2734 = vst [vmem:[%s5052_s18 + $0x70] sm:$0xff] %v3826_v21  ;;  %3851 = vpow2.f32 %v2648_v55 }
 0x63f   : > { %v3830_v39 = vpop.eup %3829  ;;  %3853 = vrcp.f32 %v2677_v24  ;;  %v2678_v14 = vadd.f32 1.0, %v3828_v52 }
 0x640   : > { %v3832_v8 = vpop.eup %3831  ;;  %2735 = vst [vmem:[%s5052_s18 + $0x78] sm:$0xff] %v3830_v39  ;;  %3855 = vpow2.f32 %v2650_v20 }
 0x641   : > { %3857 = vrcp.f32 %v2678_v14  ;;  %v2679_v28 = vadd.f32 1.0, %v3832_v8 }
 0x642   : > { %v3834_v35 = vpop.eup %3833  ;;  %3859 = vpow2.f32 %v2652_v26 }
 0x643   : > { %v3836_v60 = vpop.eup %3835  ;;  %2736 = vst [vmem:[%s5052_s18 + $0x80] sm:$0xff] %v3834_v35  ;;  %3861 = vrcp.f32 %v2679_v28 }
 0x644   : > { %v3838_v19 = vpop.eup %3837  ;;  %v2680_v38 = vadd.f32 1.0, %v3836_v60  ;;  %3863 = vpow2.f32 %v2654_v30 }
 0x645   : > { %v3840_v54 = vpop.eup %3839  ;;  %2737 = vst [vmem:[%s5052_s18 + $0x88] sm:$0xff] %v3838_v19 }
 0x646   : > { %v3842_v2 = vpop.eup %3841  ;;  %3865 = vrcp.f32 %v2680_v38  ;;  %v2681_v47 = vadd.f32 1.0, %v3840_v54 }
 0x647   : > { %v3844_v43 = vpop.eup %3843  ;;  %2738 = vst [vmem:[%s5052_s18 + $0x90] sm:$0xff] %v3842_v2 }
 0x648   : > { %v3846_v34 = vpop.eup %3845  ;;  %3867 = vrcp.f32 %v2681_v47  ;;  %v2682_v49 = vadd.f32 1.0, %v3844_v43 }
 0x649   : > { %v3848_v11 = vpop.eup %3847  ;;  %2739 = vst [vmem:[%s5052_s18 + $0x98] sm:$0xff] %v3846_v34 }
 0x64a   : > { %v3850_v27 = vpop.eup %3849  ;;  %3869 = vrcp.f32 %v2682_v49  ;;  %v2683_v36 = vadd.f32 1.0, %v3848_v11 }
 0x64b   : > { %v3852_v17 = vpop.eup %3851  ;;  %2740 = vst [vmem:[%s5052_s18 + $0xa0] sm:$0xff] %v3850_v27 }
 0x64c   : > { %v3854_v37 = vpop.eup %3853  ;;  %3871 = vrcp.f32 %v2683_v36  ;;  %v2684_v0 = vadd.f32 1.0, %v3852_v17 }
 0x64d   : > { %v3856_v23 = vpop.eup %3855  ;;  %2741 = vst [vmem:[%s5052_s18 + $0xa8] sm:$0xff] %v3854_v37 }
 0x64e   : > { %v3858_v32 = vpop.eup %3857  ;;  %3873 = vrcp.f32 %v2684_v0  ;;  %v2685_v46 = vadd.f32 1.0, %v3856_v23 }
 0x64f   : > { %v3860_v6 = vpop.eup %3859  ;;  %2742 = vst [vmem:[%s5052_s18 + $0xb0] sm:$0xff] %v3858_v32 }
 0x650   : > { %v3862_v56 = vpop.eup %3861  ;;  %3875 = vrcp.f32 %v2685_v46  ;;  %v2686_v48 = vadd.f32 1.0, %v3860_v6 }
 0x651   : > { %v3864_v22 = vpop.eup %3863  ;;  %2743 = vst [vmem:[%s5052_s18 + $0xb8] sm:$0xff] %v3862_v56 }
 0x652   : > { %3877 = vrcp.f32 %v2686_v48  ;;  %v2687_v61 = vadd.f32 1.0, %v3864_v22 }
 0x653   : > { %v3866_v41 = vpop.eup %3865 }
 0x654   : > { %2744 = vst [vmem:[%s5052_s18 + $0xc0] sm:$0xff] %v3866_v41  ;;  %3879 = vrcp.f32 %v2687_v61 }
 0x655   : > { %v3868_v50 = vpop.eup %3867 }
 0x656   : > { %2745 = vst [vmem:[%s5052_s18 + $0xc8] sm:$0xff] %v3868_v50 }
 0x657   : > { %v3870_v1 = vpop.eup %3869 }
 0x658   : > { %2746 = vst [vmem:[%s5052_s18 + $0xd0] sm:$0xff] %v3870_v1 }
 0x659   : > { %v3872_v9 = vpop.eup %3871 }
 0x65a   : > { %2747 = vst [vmem:[%s5052_s18 + $0xd8] sm:$0xff] %v3872_v9 }
 0x65b   : > { %v3874_v42 = vpop.eup %3873 }
 0x65c   : > { %2748 = vst [vmem:[%s5052_s18 + $0xe0] sm:$0xff] %v3874_v42 }
 0x65d   : > { %v3876_v12 = vpop.eup %3875 }
 0x65e   : > { %2749 = vst [vmem:[%s5052_s18 + $0xe8] sm:$0xff] %v3876_v12 }
 0x65f   : > { %v3878_v3 = vpop.eup %3877 }
 0x660   : > { %2750 = vst [vmem:[%s5052_s18 + $0xf0] sm:$0xff] %v3878_v3 }
 0x661   : > { %v3880_v10 = vpop.eup %3879 }
 0x662   : > { %2751 = vst [vmem:[%s5052_s18 + $0xf8] sm:$0xff] %v3880_v10 }
 0x663   : > { %4078 = shalt.err (!%p4075_p3)
}
 0x664   : > { %s4079_s5 = scalar_lea.hbm %s5106_s23, 4096  ;;  %s4083_s18 = scalar_lea.hbm %s5205_s15, 8192 }
 0x665   : > { %p4080_p4 = scmp.ne.s32.totalorder %s5106_s23, %s4079_s5  ;;  %p4084_p0 = scmp.lt.s32.totalorder %s5106_s23, %s5205_s15 }
 0x666   : > { %p4085_p7 = scmp.lt.s32.totalorder %s4083_s18, %s4079_s5 }
 0x667   : > { %p4081_p6 = pnand %p4080_p4, %p5206_p8 }
 0x668   : > { %p4086_p2 = por %p4085_p7, %p4084_p0 }
 0x669   : > { %p4082_p12 = pneg %p4081_p6 }
 0x66b   : > { %p4087_p9 = pnand %p4086_p2, %p4082_p12 }
 0x66d   : > { %4090 = shalt.err (!%p4087_p9)
}
 0x66e   : > { %s4158_s4 = smov 256   ;;  %s4159_s29 = smov 16  }
 0x66f   : > { %3375 = dma.vmem_to_hbm [thread:$0]  (%p5206_p8), %s5108_s2, 4096, %s5106_s23, %s2753_s19, %s4158_s4, %s4158_s4, %s4159_s29  }
 0x670 PF: > { %s2782_s14 = sand.u32 1, %s4129_s25   ;;  %p5207_p10 = scmp.ne.s32.totalorder %s5195_s1, 0 }
 0x671   : > { %p5208_p11 = scmp.ge.s32.totalorder %s4141_s28, 2  ;;  %s2783_s24 = scalar_lea.sflag [#allocation4], %s2782_s14 }
 0x673   : > { %p3401_p13 = pnand %p5208_p11, %p5207_p10 }
 0x675   : > { %p3402_p5 = pneg %p3401_p13 }
 0x677   : > { %4124 = dma.done.wait (%p3402_p5), %s2783_s24, 4096  }
 0x678   : > { %4126 = vsyncadd (%p3402_p5), %s2783_s24, 4294963200  ;;  %p29_p1 = scmp.ge.s32.totalorder %s4347_s21, 4   ;;  %s5209_s25 = smov %s4133_s26 }
 0x679   : > { %s5210_s26 = smov %s4137_s27  ;;  %s5211_s27 = smov %s4358_s17 }
 0x67a   : > { %s5212_s28 = smov %s4347_s21  ;;  %31 = sbr.rel (!%p29_p1) target bundleno = 16 (0x10), region = 141 }
 0x67f   :  { %2788 = vsyncpa [#allocation3], 1 }
 0x680   :  { %2790 = vsyncpa [#allocation3 + $0x1], 1 }
 0x681   :  { %2791 = vsyncpa [#allocation6], 1 }
 0x682   :  { %2792 = vsyncpa [#allocation9], 1 }
 0x683   :  { %2793 = vsyncpa [#allocation12], 1 }
 0x684   :  { %2794 = vsyncpa [#allocation4], 1 }
 0x685   :  { %2796 = vsyncpa [#allocation4 + $0x1], 1 }

</bundles_post_ra>
